<compile_context>
chip_gen: v7x
topology: tpu7x:2x2x1
jax: 0.10.0
libtpu: 0.0.40
codegen_flags: <defaults>
</compile_context>

<pallas_src>
import functools

import jax
import jax.numpy as jnp
from jax.experimental import pallas as pl
from jax.experimental.pallas import tpu as pltpu


# ------------------------- Fused forward kernel ---------------------------- #
def _gumbel_anchor_fused_kernel(x_ref, xg_ref, wlin_ref, eg_ref, wbc_ref,
                                wgnn_ref, bgnn_ref, out_ref, *,
                                heads, out_dim, K, tau, mxu_dtype):
    f32 = jnp.float32
    N = x_ref.shape[0]
    A = eg_ref.shape[0]
    D = out_dim
    Nh = N // heads

    # a @ b.T / a.T @ b without materializing a transpose.
    CONTRACT_LAST = (((1,), (1,)), ((), ()))     # (m,k),(n,k) -> (m,n)
    CONTRACT_FIRST = (((0,), (0,)), ((), ()))    # (k,m),(k,n) -> (m,n)

    def mm(a, b, dn=None):
        a = a.astype(mxu_dtype)
        b = b.astype(mxu_dtype)
        if dn is None:
            return jnp.dot(a, b, preferred_element_type=f32)
        return jax.lax.dot_general(a, b, dimension_numbers=dn,
                                   preferred_element_type=f32)

    x = x_ref[...]                               # (N, in)  original node order
    eg = eg_ref[...]                             # (A, N)   grouped column order
    wbc = wbc_ref[...]                           # (2, D)   merged b/c weights

    # ---- q = x @ W_lin stays on-chip (no HBM round trip) -------------------
    q = mm(x, wlin_ref[...])                     # (N, heads*D) f32
    q_sq = jnp.sum(q * q)                        # Frobenius norm is reshape-invariant

    # ---- pass 1 (all MXU work): raw logits / gate pre-acts / norms ---------
    # torch's q.reshape(heads, -1, D) block for head h is the contiguous row
    # block q[h*Nh:(h+1)*Nh]; its rows in grouped order j = s*Nh + p map to
    # torch index heads*p + s and are addressed purely through contiguous
    # column slices q_block[:, s*D:(s+1)*D].
    logits_raw = []                              # heads x (A, N), grouped cols
    bc_raw = []                                  # heads x (2, N), grouped cols
    aq_sq = f32(0.0)
    for h in range(heads):                       # static unroll, heads is tiny
        qb = q[h * Nh:(h + 1) * Nh, :]                           # (Nh, heads*D)
        aqh = jnp.zeros((A, D), f32)                             # anchor_q, head h
        for s in range(heads):
            aqh = aqh + mm(eg[:, s * Nh:(s + 1) * Nh],
                           qb[:, s * D:(s + 1) * D])             # (A, D)
        aq_sq = aq_sq + jnp.sum(aqh * aqh)

        l_parts, bc_parts = [], []
        for s in range(heads):
            qbs = qb[:, s * D:(s + 1) * D]                       # (Nh, D)
            l_parts.append(mm(aqh, qbs, CONTRACT_LAST))          # (A, Nh)
            bc_parts.append(mm(wbc, qbs, CONTRACT_LAST))         # (2, Nh)
        logits_raw.append(jnp.concatenate(l_parts, axis=1))      # (A, N)
        bc_raw.append(jnp.concatenate(bc_parts, axis=1))         # (2, N)

    # torch.norm(q, p=2) with no dim -> scalar Frobenius norm of whole tensor;
    # the scales are scalars, so they commute with every matmul above.
    q_scale = 1.0 / (jnp.sqrt(q_sq) + 1e-10)
    aq_scale = 1.0 / (jnp.sqrt(aq_sq) + 1e-10)
    qaq_scale = q_scale * aq_scale
    inv_tau = f32(1.0 / tau)

    # ---- pass 2 (pure VPU/EUP): gates, eval-mode gumbel softmax, attention -
    att = jnp.zeros((A, N), f32)   # anchor-major: softmax reduces over sublanes
    for h in range(heads):                       # static unroll
        gates = 1.0 / (1.0 + jnp.exp(-(bc_raw[h] * q_scale)))    # (2, N), 1 pass
        b = gates[0:1, :]
        c = jnp.maximum(gates[1:2, :], 1e-30)    # guard x / (-0.1 * 0) -> NaN
        diff = logits_raw[h] * qaq_scale - b
        g = jnp.exp(diff * diff / (-0.1 * c))                    # (A, N)
        # gumbel_softmax_sample, is_train=False: softmax(g / tau) over anchors;
        # the K repeated copies are identical, so their sum is K * softmax.
        z = g * inv_tau
        z = z - jnp.max(z, axis=0, keepdims=True)
        p = jnp.exp(z)
        att = att + p * pl.reciprocal(jnp.sum(p, axis=0, keepdims=True),
                                      approx=True)
    att = att * f32(K / heads)                   # * K copies, mean over heads

    # ---- stand-in DenseAnchorGraphConv (reassociated tail) -----------------
    #   out = att^T @ ((att @ x) @ W_gnn) + b_gnn
    anchor_feat = mm(att, xg_ref[...])                           # (A, in)
    anchor_out = mm(anchor_feat, wgnn_ref[...])                  # (A, D)
    bg = bgnn_ref[...]                                           # (1, D)
    out_parts = []
    for s in range(heads):
        out_parts.append(mm(att[:, s * Nh:(s + 1) * Nh], anchor_out,
                            CONTRACT_FIRST) + bg)                # (Nh, D)
    # lane-dense (Nh, heads*D) slab; the wrapper reshape restores (N, D) order
    out_ref[...] = jnp.concatenate(out_parts, axis=1)


# --------------------------------- Wrapper --------------------------------- #
def gumbel_anchor_gcn_forward(x, params, *, heads, out_dim, K, tau,
                              mxu_dtype=jnp.float32):
    num_nodes, in_dim = x.shape
    anchor_nodes = params["E"].shape[0]
    assert num_nodes % heads == 0, "faithful torch reshape needs N % heads == 0"
    n_per_head = num_nodes // heads

    # ---- wrapper-side layout plumbing (replaces in-kernel selection mats) --
    # grouped index j = s*(N/heads) + p  <->  torch-reshape index heads*p + s
    wbc = jnp.concatenate([params["W_b"], params["W_c"]], axis=1).T      # (2, D)
    e_grouped = (params["E"].reshape(anchor_nodes, n_per_head, heads)
                 .swapaxes(1, 2).reshape(anchor_nodes, num_nodes))
    x_grouped = (x.reshape(n_per_head, heads, in_dim)
                 .swapaxes(0, 1).reshape(num_nodes, in_dim))

    full = lambda shape: pl.BlockSpec(shape, lambda i: (0,) * len(shape))

    # explicit VMEM budget (v7x scoped default 32 MiB of 64 MiB physical)
    est = 4 * (2 * x.size + params["W_lin"].size + params["E"].size
               + 2 * out_dim + params["W_gnn"].size + params["b_gnn"].size
               + num_nodes * heads * out_dim                # q
               + heads * (anchor_nodes + 2) * num_nodes     # cross-pass state
               + anchor_nodes * num_nodes                   # att
               + num_nodes * out_dim)                       # out
    vmem_limit = int(min(64 * 2 ** 20, max(4 * 2 ** 20, 8 * est)))

    out_blocks = pl.pallas_call(
        functools.partial(_gumbel_anchor_fused_kernel, heads=heads,
                          out_dim=out_dim, K=K, tau=tau, mxu_dtype=mxu_dtype),
        out_shape=jax.ShapeDtypeStruct((n_per_head, heads * out_dim),
                                       jnp.float32),
        grid=(1,),
        in_specs=[full((num_nodes, in_dim)),            # x (original order)
                  full((num_nodes, in_dim)),            # x (grouped order)
                  full((in_dim, heads * out_dim)),      # W_lin
                  full((anchor_nodes, num_nodes)),      # E (grouped columns)
                  full((2, out_dim)),                   # merged W_b / W_c
                  full((in_dim, out_dim)),              # W_gnn
                  full((1, out_dim))],                  # b_gnn
        out_specs=full((n_per_head, heads * out_dim)),
        compiler_params=pltpu.CompilerParams(
            dimension_semantics=("arbitrary",),
            vmem_limit_bytes=vmem_limit),
    )(x, x_grouped, params["W_lin"], e_grouped, wbc,
      params["W_gnn"], params["b_gnn"])

    # row (heads*p + s) of the result lives at out_blocks[p, s*D:(s+1)*D];
    # a plain row-major reshape restores (N, out_dim) order for free.
    return out_blocks.reshape(num_nodes, out_dim)


# ----------------------- Pure-JAX reference (eval path) -------------------- #
def reference_forward(x, params, *, heads, out_dim, K, tau):
    hi = jax.lax.Precision.HIGHEST
    q = jnp.dot(x, params["W_lin"], precision=hi)                # (N, H*D)
    q3 = q.reshape(heads, -1, out_dim)                           # (H, N, D)
    aq = jnp.einsum("an,hnd->had", params["E"], q3, precision=hi)
    qn = q3 / (jnp.linalg.norm(q3) + 1e-10)
    aqn = aq / (jnp.linalg.norm(aq) + 1e-10)
    logits = jnp.einsum("hnd,had->hna", qn, aqn, precision=hi)   # (H, N, A)
    b = jax.nn.sigmoid(jnp.einsum("hnd,do->hno", qn, params["W_b"], precision=hi))
    c = jax.nn.sigmoid(jnp.einsum("hnd,do->hno", qn, params["W_c"], precision=hi))
    logits = jnp.exp((logits - b) ** 2 / (-0.1 * c))
    y = jax.nn.softmax(logits / tau, axis=-1)                    # eval gumbel
    attention = (K / heads) * jnp.sum(y, axis=0)                 # (N, A)
    # same stand-in DenseAnchorGraphConv as the kernel
    anchor_feat = jnp.einsum("na,nf->af", attention, x, precision=hi)
    anchor_out = jnp.dot(anchor_feat, params["W_gnn"], precision=hi)
    return jnp.einsum("na,ad->nd", attention, anchor_out,
                      precision=hi) + params["b_gnn"]


# ------------------------------ Param helpers ------------------------------ #
def glorot(key, shape):
    fan_in, fan_out = shape[-2], shape[-1]
    limit = jnp.sqrt(6.0 / (fan_in + fan_out))
    return jax.random.uniform(key, shape, jnp.float32, -limit, limit)


def init_params(key, in_dim, out_dim, num_nodes, anchor_nodes, heads):
    ks = jax.random.split(key, 6)
    return {
        # stored pre-transposed so the kernel computes x @ W directly
        "W_lin": glorot(ks[0], (in_dim, heads * out_dim)),
        "W_b":   glorot(ks[1], (out_dim, 1)),
        "W_c":   glorot(ks[2], (out_dim, 1)),
        "E":     glorot(ks[3], (anchor_nodes, num_nodes)),
        "W_gnn": glorot(ks[4], (in_dim, out_dim)),
        "b_gnn": jnp.zeros((1, out_dim), jnp.float32),
    }


# ---------------------------------- Main ----------------------------------- #
if __name__ == "__main__":
    in_dim, out_dim = 16, 32
    num_nodes, anchor_nodes = 64, 8
    heads, K, tau = 4, 5, 0.25

    key = jax.random.PRNGKey(0)
    kx, kp = jax.random.split(key)
    x = jax.random.normal(kx, (num_nodes, in_dim), jnp.float32)
    params = init_params(kp, in_dim, out_dim, num_nodes, anchor_nodes, heads)

    out = gumbel_anchor_gcn_forward(x, params, heads=heads, out_dim=out_dim,
                                    K=K, tau=tau)
    out = jax.block_until_ready(out)

    assert out.shape == (num_nodes, out_dim)
    assert bool(jnp.all(jnp.isfinite(out)))

    ref = reference_forward(x, params, heads=heads, out_dim=out_dim, K=K, tau=tau)
    max_err = float(jnp.max(jnp.abs(out - ref)))
    assert bool(jnp.allclose(out, ref, rtol=5e-2, atol=5e-2)), max_err

    print("KERNEL_OK")
</pallas_src>

<mosaic_0001>
module attributes {stable_mosaic.version = 11 : i64} {
  func.func @_gumbel_anchor_fused_kernel(%arg0: i32, %arg1: memref<64x16xf32, #tpu.memory_space<vmem>>, %arg2: memref<64x16xf32, #tpu.memory_space<vmem>>, %arg3: memref<16x128xf32, #tpu.memory_space<vmem>>, %arg4: memref<8x64xf32, #tpu.memory_space<vmem>>, %arg5: memref<2x32xf32, #tpu.memory_space<vmem>>, %arg6: memref<16x32xf32, #tpu.memory_space<vmem>>, %arg7: memref<1x32xf32, #tpu.memory_space<vmem>>, %arg8: memref<16x128xf32, #tpu.memory_space<vmem>>) attributes {dimension_semantics = [#tpu.dimension_semantics<arbitrary>], iteration_bounds = array<i64: 1>, scalar_prefetch = 0 : i64, scratch_operands = 0 : i64, tpu.core_type = #tpu.core_type<tc>, window_params = [{pipeline_mode = #tpu.pipeline_mode<synchronous>, transform_indices = @transform_0, window_bounds = array<i64: 64, 16>}, {pipeline_mode = #tpu.pipeline_mode<synchronous>, transform_indices = @transform_1, window_bounds = array<i64: 64, 16>}, {pipeline_mode = #tpu.pipeline_mode<synchronous>, transform_indices = @transform_2, window_bounds = array<i64: 16, 128>}, {pipeline_mode = #tpu.pipeline_mode<synchronous>, transform_indices = @transform_3, window_bounds = array<i64: 8, 64>}, {pipeline_mode = #tpu.pipeline_mode<synchronous>, transform_indices = @transform_4, window_bounds = array<i64: 2, 32>}, {pipeline_mode = #tpu.pipeline_mode<synchronous>, transform_indices = @transform_5, window_bounds = array<i64: 16, 32>}, {pipeline_mode = #tpu.pipeline_mode<synchronous>, transform_indices = @transform_6, window_bounds = array<i64: 1, 32>}, {pipeline_mode = #tpu.pipeline_mode<synchronous>, transform_indices = @transform_7, window_bounds = array<i64: 16, 128>}]} {
    %c0 = arith.constant 0 : index
    %c0_0 = arith.constant 0 : index
    %0 = vector.load %arg1[%c0, %c0_0] : memref<64x16xf32, #tpu.memory_space<vmem>>, vector<64x16xf32>
    %c0_1 = arith.constant 0 : index
    %c0_2 = arith.constant 0 : index
    %1 = vector.load %arg4[%c0_1, %c0_2] : memref<8x64xf32, #tpu.memory_space<vmem>>, vector<8x64xf32>
    %c0_3 = arith.constant 0 : index
    %c0_4 = arith.constant 0 : index
    %2 = vector.load %arg5[%c0_3, %c0_4] : memref<2x32xf32, #tpu.memory_space<vmem>>, vector<2x32xf32>
    %c0_5 = arith.constant 0 : index
    %c0_6 = arith.constant 0 : index
    %3 = vector.load %arg3[%c0_5, %c0_6] : memref<16x128xf32, #tpu.memory_space<vmem>>, vector<16x128xf32>
    %cst = arith.constant dense<0.000000e+00> : vector<64x128xf32>
    %4 = tpu.matmul %0, %3, %cst {dimension_numbers = #tpu.dot_dimension_numbers<[1], [0], [0], [1], [0, 0, 1, 1], [], []>} : vector<64x16xf32>, vector<16x128xf32>, vector<64x128xf32> -> vector<64x128xf32>
    %5 = arith.mulf %4, %4 : vector<64x128xf32>
    %6 = vector.shape_cast %5 : vector<64x128xf32> to vector<1x64x128xf32>
    %cst_7 = arith.constant dense<0.000000e+00> : vector<1xf32>
    %7 = vector.multi_reduction <add>, %6, %cst_7 [1, 2] : vector<1x64x128xf32> to vector<1xf32>
    %8 = vector.shape_cast %7 : vector<1xf32> to vector<1x1x1xf32>
    %9 = vector.extract %8[0, 0, 0] : f32 from vector<1x1x1xf32>
    %10 = vector.extract_strided_slice %4 {offsets = [0, 0], sizes = [16, 128], strides = [1, 1]} : vector<64x128xf32> to vector<16x128xf32>
    %cst_8 = arith.constant 0.000000e+00 : f32
    %11 = vector.broadcast %cst_8 : f32 to vector<8x32xf32>
    %12 = vector.extract_strided_slice %1 {offsets = [0, 0], sizes = [8, 16], strides = [1, 1]} : vector<8x64xf32> to vector<8x16xf32>
    %13 = vector.extract_strided_slice %10 {offsets = [0, 0], sizes = [16, 32], strides = [1, 1]} : vector<16x128xf32> to vector<16x32xf32>
    %cst_9 = arith.constant dense<0.000000e+00> : vector<8x32xf32>
    %14 = tpu.matmul %12, %13, %cst_9 {dimension_numbers = #tpu.dot_dimension_numbers<[1], [0], [0], [1], [0, 0, 1, 1], [], []>} : vector<8x16xf32>, vector<16x32xf32>, vector<8x32xf32> -> vector<8x32xf32>
    %15 = arith.addf %11, %14 : vector<8x32xf32>
    %16 = vector.extract_strided_slice %1 {offsets = [0, 16], sizes = [8, 16], strides = [1, 1]} : vector<8x64xf32> to vector<8x16xf32>
    %17 = vector.extract_strided_slice %10 {offsets = [0, 32], sizes = [16, 32], strides = [1, 1]} : vector<16x128xf32> to vector<16x32xf32>
    %cst_10 = arith.constant dense<0.000000e+00> : vector<8x32xf32>
    %18 = tpu.matmul %16, %17, %cst_10 {dimension_numbers = #tpu.dot_dimension_numbers<[1], [0], [0], [1], [0, 0, 1, 1], [], []>} : vector<8x16xf32>, vector<16x32xf32>, vector<8x32xf32> -> vector<8x32xf32>
    %19 = arith.addf %15, %18 : vector<8x32xf32>
    %20 = vector.extract_strided_slice %1 {offsets = [0, 32], sizes = [8, 16], strides = [1, 1]} : vector<8x64xf32> to vector<8x16xf32>
    %21 = vector.extract_strided_slice %10 {offsets = [0, 64], sizes = [16, 32], strides = [1, 1]} : vector<16x128xf32> to vector<16x32xf32>
    %cst_11 = arith.constant dense<0.000000e+00> : vector<8x32xf32>
    %22 = tpu.matmul %20, %21, %cst_11 {dimension_numbers = #tpu.dot_dimension_numbers<[1], [0], [0], [1], [0, 0, 1, 1], [], []>} : vector<8x16xf32>, vector<16x32xf32>, vector<8x32xf32> -> vector<8x32xf32>
    %23 = arith.addf %19, %22 : vector<8x32xf32>
    %24 = vector.extract_strided_slice %1 {offsets = [0, 48], sizes = [8, 16], strides = [1, 1]} : vector<8x64xf32> to vector<8x16xf32>
    %25 = vector.extract_strided_slice %10 {offsets = [0, 96], sizes = [16, 32], strides = [1, 1]} : vector<16x128xf32> to vector<16x32xf32>
    %cst_12 = arith.constant dense<0.000000e+00> : vector<8x32xf32>
    %26 = tpu.matmul %24, %25, %cst_12 {dimension_numbers = #tpu.dot_dimension_numbers<[1], [0], [0], [1], [0, 0, 1, 1], [], []>} : vector<8x16xf32>, vector<16x32xf32>, vector<8x32xf32> -> vector<8x32xf32>
    %27 = arith.addf %23, %26 : vector<8x32xf32>
    %28 = arith.mulf %27, %27 : vector<8x32xf32>
    %29 = vector.shape_cast %28 : vector<8x32xf32> to vector<1x8x32xf32>
    %cst_13 = arith.constant dense<0.000000e+00> : vector<1xf32>
    %30 = vector.multi_reduction <add>, %29, %cst_13 [1, 2] : vector<1x8x32xf32> to vector<1xf32>
    %31 = vector.shape_cast %30 : vector<1xf32> to vector<1x1x1xf32>
    %32 = vector.extract %31[0, 0, 0] : f32 from vector<1x1x1xf32>
    %cst_14 = arith.constant 0.000000e+00 : f32
    %33 = arith.addf %cst_14, %32 : f32
    %34 = vector.extract_strided_slice %10 {offsets = [0, 0], sizes = [16, 32], strides = [1, 1]} : vector<16x128xf32> to vector<16x32xf32>
    %cst_15 = arith.constant dense<0.000000e+00> : vector<8x16xf32>
    %35 = tpu.matmul %27, %34, %cst_15 {dimension_numbers = #tpu.dot_dimension_numbers<[1], [1], [0], [0], [0, 0, 1, 0], [], []>} : vector<8x32xf32>, vector<16x32xf32>, vector<8x16xf32> -> vector<8x16xf32>
    %cst_16 = arith.constant dense<0.000000e+00> : vector<2x16xf32>
    %36 = tpu.matmul %2, %34, %cst_16 {dimension_numbers = #tpu.dot_dimension_numbers<[1], [1], [0], [0], [0, 0, 1, 0], [], []>} : vector<2x32xf32>, vector<16x32xf32>, vector<2x16xf32> -> vector<2x16xf32>
    %37 = vector.extract_strided_slice %10 {offsets = [0, 32], sizes = [16, 32], strides = [1, 1]} : vector<16x128xf32> to vector<16x32xf32>
    %cst_17 = arith.constant dense<0.000000e+00> : vector<8x16xf32>
    %38 = tpu.matmul %27, %37, %cst_17 {dimension_numbers = #tpu.dot_dimension_numbers<[1], [1], [0], [0], [0, 0, 1, 0], [], []>} : vector<8x32xf32>, vector<16x32xf32>, vector<8x16xf32> -> vector<8x16xf32>
    %cst_18 = arith.constant dense<0.000000e+00> : vector<2x16xf32>
    %39 = tpu.matmul %2, %37, %cst_18 {dimension_numbers = #tpu.dot_dimension_numbers<[1], [1], [0], [0], [0, 0, 1, 0], [], []>} : vector<2x32xf32>, vector<16x32xf32>, vector<2x16xf32> -> vector<2x16xf32>
    %40 = vector.extract_strided_slice %10 {offsets = [0, 64], sizes = [16, 32], strides = [1, 1]} : vector<16x128xf32> to vector<16x32xf32>
    %cst_19 = arith.constant dense<0.000000e+00> : vector<8x16xf32>
    %41 = tpu.matmul %27, %40, %cst_19 {dimension_numbers = #tpu.dot_dimension_numbers<[1], [1], [0], [0], [0, 0, 1, 0], [], []>} : vector<8x32xf32>, vector<16x32xf32>, vector<8x16xf32> -> vector<8x16xf32>
    %cst_20 = arith.constant dense<0.000000e+00> : vector<2x16xf32>
    %42 = tpu.matmul %2, %40, %cst_20 {dimension_numbers = #tpu.dot_dimension_numbers<[1], [1], [0], [0], [0, 0, 1, 0], [], []>} : vector<2x32xf32>, vector<16x32xf32>, vector<2x16xf32> -> vector<2x16xf32>
    %43 = vector.extract_strided_slice %10 {offsets = [0, 96], sizes = [16, 32], strides = [1, 1]} : vector<16x128xf32> to vector<16x32xf32>
    %cst_21 = arith.constant dense<0.000000e+00> : vector<8x16xf32>
    %44 = tpu.matmul %27, %43, %cst_21 {dimension_numbers = #tpu.dot_dimension_numbers<[1], [1], [0], [0], [0, 0, 1, 0], [], []>} : vector<8x32xf32>, vector<16x32xf32>, vector<8x16xf32> -> vector<8x16xf32>
    %cst_22 = arith.constant dense<0.000000e+00> : vector<2x16xf32>
    %45 = tpu.matmul %2, %43, %cst_22 {dimension_numbers = #tpu.dot_dimension_numbers<[1], [1], [0], [0], [0, 0, 1, 0], [], []>} : vector<2x32xf32>, vector<16x32xf32>, vector<2x16xf32> -> vector<2x16xf32>
    %46 = tpu.concatenate %35, %38, %41, %44 in 1 : vector<8x16xf32>, vector<8x16xf32>, vector<8x16xf32>, vector<8x16xf32> -> vector<8x64xf32>
    %47 = tpu.concatenate %36, %39, %42, %45 in 1 : vector<2x16xf32>, vector<2x16xf32>, vector<2x16xf32>, vector<2x16xf32> -> vector<2x64xf32>
    %48 = vector.extract_strided_slice %4 {offsets = [16, 0], sizes = [16, 128], strides = [1, 1]} : vector<64x128xf32> to vector<16x128xf32>
    %cst_23 = arith.constant 0.000000e+00 : f32
    %49 = vector.broadcast %cst_23 : f32 to vector<8x32xf32>
    %50 = vector.extract_strided_slice %1 {offsets = [0, 0], sizes = [8, 16], strides = [1, 1]} : vector<8x64xf32> to vector<8x16xf32>
    %51 = vector.extract_strided_slice %48 {offsets = [0, 0], sizes = [16, 32], strides = [1, 1]} : vector<16x128xf32> to vector<16x32xf32>
    %cst_24 = arith.constant dense<0.000000e+00> : vector<8x32xf32>
    %52 = tpu.matmul %50, %51, %cst_24 {dimension_numbers = #tpu.dot_dimension_numbers<[1], [0], [0], [1], [0, 0, 1, 1], [], []>} : vector<8x16xf32>, vector<16x32xf32>, vector<8x32xf32> -> vector<8x32xf32>
    %53 = arith.addf %49, %52 : vector<8x32xf32>
    %54 = vector.extract_strided_slice %1 {offsets = [0, 16], sizes = [8, 16], strides = [1, 1]} : vector<8x64xf32> to vector<8x16xf32>
    %55 = vector.extract_strided_slice %48 {offsets = [0, 32], sizes = [16, 32], strides = [1, 1]} : vector<16x128xf32> to vector<16x32xf32>
    %cst_25 = arith.constant dense<0.000000e+00> : vector<8x32xf32>
    %56 = tpu.matmul %54, %55, %cst_25 {dimension_numbers = #tpu.dot_dimension_numbers<[1], [0], [0], [1], [0, 0, 1, 1], [], []>} : vector<8x16xf32>, vector<16x32xf32>, vector<8x32xf32> -> vector<8x32xf32>
    %57 = arith.addf %53, %56 : vector<8x32xf32>
    %58 = vector.extract_strided_slice %1 {offsets = [0, 32], sizes = [8, 16], strides = [1, 1]} : vector<8x64xf32> to vector<8x16xf32>
    %59 = vector.extract_strided_slice %48 {offsets = [0, 64], sizes = [16, 32], strides = [1, 1]} : vector<16x128xf32> to vector<16x32xf32>
    %cst_26 = arith.constant dense<0.000000e+00> : vector<8x32xf32>
    %60 = tpu.matmul %58, %59, %cst_26 {dimension_numbers = #tpu.dot_dimension_numbers<[1], [0], [0], [1], [0, 0, 1, 1], [], []>} : vector<8x16xf32>, vector<16x32xf32>, vector<8x32xf32> -> vector<8x32xf32>
    %61 = arith.addf %57, %60 : vector<8x32xf32>
    %62 = vector.extract_strided_slice %1 {offsets = [0, 48], sizes = [8, 16], strides = [1, 1]} : vector<8x64xf32> to vector<8x16xf32>
    %63 = vector.extract_strided_slice %48 {offsets = [0, 96], sizes = [16, 32], strides = [1, 1]} : vector<16x128xf32> to vector<16x32xf32>
    %cst_27 = arith.constant dense<0.000000e+00> : vector<8x32xf32>
    %64 = tpu.matmul %62, %63, %cst_27 {dimension_numbers = #tpu.dot_dimension_numbers<[1], [0], [0], [1], [0, 0, 1, 1], [], []>} : vector<8x16xf32>, vector<16x32xf32>, vector<8x32xf32> -> vector<8x32xf32>
    %65 = arith.addf %61, %64 : vector<8x32xf32>
    %66 = arith.mulf %65, %65 : vector<8x32xf32>
    %67 = vector.shape_cast %66 : vector<8x32xf32> to vector<1x8x32xf32>
    %cst_28 = arith.constant dense<0.000000e+00> : vector<1xf32>
    %68 = vector.multi_reduction <add>, %67, %cst_28 [1, 2] : vector<1x8x32xf32> to vector<1xf32>
    %69 = vector.shape_cast %68 : vector<1xf32> to vector<1x1x1xf32>
    %70 = vector.extract %69[0, 0, 0] : f32 from vector<1x1x1xf32>
    %71 = arith.addf %33, %70 : f32
    %72 = vector.extract_strided_slice %48 {offsets = [0, 0], sizes = [16, 32], strides = [1, 1]} : vector<16x128xf32> to vector<16x32xf32>
    %cst_29 = arith.constant dense<0.000000e+00> : vector<8x16xf32>
    %73 = tpu.matmul %65, %72, %cst_29 {dimension_numbers = #tpu.dot_dimension_numbers<[1], [1], [0], [0], [0, 0, 1, 0], [], []>} : vector<8x32xf32>, vector<16x32xf32>, vector<8x16xf32> -> vector<8x16xf32>
    %cst_30 = arith.constant dense<0.000000e+00> : vector<2x16xf32>
    %74 = tpu.matmul %2, %72, %cst_30 {dimension_numbers = #tpu.dot_dimension_numbers<[1], [1], [0], [0], [0, 0, 1, 0], [], []>} : vector<2x32xf32>, vector<16x32xf32>, vector<2x16xf32> -> vector<2x16xf32>
    %75 = vector.extract_strided_slice %48 {offsets = [0, 32], sizes = [16, 32], strides = [1, 1]} : vector<16x128xf32> to vector<16x32xf32>
    %cst_31 = arith.constant dense<0.000000e+00> : vector<8x16xf32>
    %76 = tpu.matmul %65, %75, %cst_31 {dimension_numbers = #tpu.dot_dimension_numbers<[1], [1], [0], [0], [0, 0, 1, 0], [], []>} : vector<8x32xf32>, vector<16x32xf32>, vector<8x16xf32> -> vector<8x16xf32>
    %cst_32 = arith.constant dense<0.000000e+00> : vector<2x16xf32>
    %77 = tpu.matmul %2, %75, %cst_32 {dimension_numbers = #tpu.dot_dimension_numbers<[1], [1], [0], [0], [0, 0, 1, 0], [], []>} : vector<2x32xf32>, vector<16x32xf32>, vector<2x16xf32> -> vector<2x16xf32>
    %78 = vector.extract_strided_slice %48 {offsets = [0, 64], sizes = [16, 32], strides = [1, 1]} : vector<16x128xf32> to vector<16x32xf32>
    %cst_33 = arith.constant dense<0.000000e+00> : vector<8x16xf32>
    %79 = tpu.matmul %65, %78, %cst_33 {dimension_numbers = #tpu.dot_dimension_numbers<[1], [1], [0], [0], [0, 0, 1, 0], [], []>} : vector<8x32xf32>, vector<16x32xf32>, vector<8x16xf32> -> vector<8x16xf32>
    %cst_34 = arith.constant dense<0.000000e+00> : vector<2x16xf32>
    %80 = tpu.matmul %2, %78, %cst_34 {dimension_numbers = #tpu.dot_dimension_numbers<[1], [1], [0], [0], [0, 0, 1, 0], [], []>} : vector<2x32xf32>, vector<16x32xf32>, vector<2x16xf32> -> vector<2x16xf32>
    %81 = vector.extract_strided_slice %48 {offsets = [0, 96], sizes = [16, 32], strides = [1, 1]} : vector<16x128xf32> to vector<16x32xf32>
    %cst_35 = arith.constant dense<0.000000e+00> : vector<8x16xf32>
    %82 = tpu.matmul %65, %81, %cst_35 {dimension_numbers = #tpu.dot_dimension_numbers<[1], [1], [0], [0], [0, 0, 1, 0], [], []>} : vector<8x32xf32>, vector<16x32xf32>, vector<8x16xf32> -> vector<8x16xf32>
    %cst_36 = arith.constant dense<0.000000e+00> : vector<2x16xf32>
    %83 = tpu.matmul %2, %81, %cst_36 {dimension_numbers = #tpu.dot_dimension_numbers<[1], [1], [0], [0], [0, 0, 1, 0], [], []>} : vector<2x32xf32>, vector<16x32xf32>, vector<2x16xf32> -> vector<2x16xf32>
    %84 = tpu.concatenate %73, %76, %79, %82 in 1 : vector<8x16xf32>, vector<8x16xf32>, vector<8x16xf32>, vector<8x16xf32> -> vector<8x64xf32>
    %85 = tpu.concatenate %74, %77, %80, %83 in 1 : vector<2x16xf32>, vector<2x16xf32>, vector<2x16xf32>, vector<2x16xf32> -> vector<2x64xf32>
    %86 = vector.extract_strided_slice %4 {offsets = [32, 0], sizes = [16, 128], strides = [1, 1]} : vector<64x128xf32> to vector<16x128xf32>
    %cst_37 = arith.constant 0.000000e+00 : f32
    %87 = vector.broadcast %cst_37 : f32 to vector<8x32xf32>
    %88 = vector.extract_strided_slice %1 {offsets = [0, 0], sizes = [8, 16], strides = [1, 1]} : vector<8x64xf32> to vector<8x16xf32>
    %89 = vector.extract_strided_slice %86 {offsets = [0, 0], sizes = [16, 32], strides = [1, 1]} : vector<16x128xf32> to vector<16x32xf32>
    %cst_38 = arith.constant dense<0.000000e+00> : vector<8x32xf32>
    %90 = tpu.matmul %88, %89, %cst_38 {dimension_numbers = #tpu.dot_dimension_numbers<[1], [0], [0], [1], [0, 0, 1, 1], [], []>} : vector<8x16xf32>, vector<16x32xf32>, vector<8x32xf32> -> vector<8x32xf32>
    %91 = arith.addf %87, %90 : vector<8x32xf32>
    %92 = vector.extract_strided_slice %1 {offsets = [0, 16], sizes = [8, 16], strides = [1, 1]} : vector<8x64xf32> to vector<8x16xf32>
    %93 = vector.extract_strided_slice %86 {offsets = [0, 32], sizes = [16, 32], strides = [1, 1]} : vector<16x128xf32> to vector<16x32xf32>
    %cst_39 = arith.constant dense<0.000000e+00> : vector<8x32xf32>
    %94 = tpu.matmul %92, %93, %cst_39 {dimension_numbers = #tpu.dot_dimension_numbers<[1], [0], [0], [1], [0, 0, 1, 1], [], []>} : vector<8x16xf32>, vector<16x32xf32>, vector<8x32xf32> -> vector<8x32xf32>
    %95 = arith.addf %91, %94 : vector<8x32xf32>
    %96 = vector.extract_strided_slice %1 {offsets = [0, 32], sizes = [8, 16], strides = [1, 1]} : vector<8x64xf32> to vector<8x16xf32>
    %97 = vector.extract_strided_slice %86 {offsets = [0, 64], sizes = [16, 32], strides = [1, 1]} : vector<16x128xf32> to vector<16x32xf32>
    %cst_40 = arith.constant dense<0.000000e+00> : vector<8x32xf32>
    %98 = tpu.matmul %96, %97, %cst_40 {dimension_numbers = #tpu.dot_dimension_numbers<[1], [0], [0], [1], [0, 0, 1, 1], [], []>} : vector<8x16xf32>, vector<16x32xf32>, vector<8x32xf32> -> vector<8x32xf32>
    %99 = arith.addf %95, %98 : vector<8x32xf32>
    %100 = vector.extract_strided_slice %1 {offsets = [0, 48], sizes = [8, 16], strides = [1, 1]} : vector<8x64xf32> to vector<8x16xf32>
    %101 = vector.extract_strided_slice %86 {offsets = [0, 96], sizes = [16, 32], strides = [1, 1]} : vector<16x128xf32> to vector<16x32xf32>
    %cst_41 = arith.constant dense<0.000000e+00> : vector<8x32xf32>
    %102 = tpu.matmul %100, %101, %cst_41 {dimension_numbers = #tpu.dot_dimension_numbers<[1], [0], [0], [1], [0, 0, 1, 1], [], []>} : vector<8x16xf32>, vector<16x32xf32>, vector<8x32xf32> -> vector<8x32xf32>
    %103 = arith.addf %99, %102 : vector<8x32xf32>
    %104 = arith.mulf %103, %103 : vector<8x32xf32>
    %105 = vector.shape_cast %104 : vector<8x32xf32> to vector<1x8x32xf32>
    %cst_42 = arith.constant dense<0.000000e+00> : vector<1xf32>
    %106 = vector.multi_reduction <add>, %105, %cst_42 [1, 2] : vector<1x8x32xf32> to vector<1xf32>
    %107 = vector.shape_cast %106 : vector<1xf32> to vector<1x1x1xf32>
    %108 = vector.extract %107[0, 0, 0] : f32 from vector<1x1x1xf32>
    %109 = arith.addf %71, %108 : f32
    %110 = vector.extract_strided_slice %86 {offsets = [0, 0], sizes = [16, 32], strides = [1, 1]} : vector<16x128xf32> to vector<16x32xf32>
    %cst_43 = arith.constant dense<0.000000e+00> : vector<8x16xf32>
    %111 = tpu.matmul %103, %110, %cst_43 {dimension_numbers = #tpu.dot_dimension_numbers<[1], [1], [0], [0], [0, 0, 1, 0], [], []>} : vector<8x32xf32>, vector<16x32xf32>, vector<8x16xf32> -> vector<8x16xf32>
    %cst_44 = arith.constant dense<0.000000e+00> : vector<2x16xf32>
    %112 = tpu.matmul %2, %110, %cst_44 {dimension_numbers = #tpu.dot_dimension_numbers<[1], [1], [0], [0], [0, 0, 1, 0], [], []>} : vector<2x32xf32>, vector<16x32xf32>, vector<2x16xf32> -> vector<2x16xf32>
    %113 = vector.extract_strided_slice %86 {offsets = [0, 32], sizes = [16, 32], strides = [1, 1]} : vector<16x128xf32> to vector<16x32xf32>
    %cst_45 = arith.constant dense<0.000000e+00> : vector<8x16xf32>
    %114 = tpu.matmul %103, %113, %cst_45 {dimension_numbers = #tpu.dot_dimension_numbers<[1], [1], [0], [0], [0, 0, 1, 0], [], []>} : vector<8x32xf32>, vector<16x32xf32>, vector<8x16xf32> -> vector<8x16xf32>
    %cst_46 = arith.constant dense<0.000000e+00> : vector<2x16xf32>
    %115 = tpu.matmul %2, %113, %cst_46 {dimension_numbers = #tpu.dot_dimension_numbers<[1], [1], [0], [0], [0, 0, 1, 0], [], []>} : vector<2x32xf32>, vector<16x32xf32>, vector<2x16xf32> -> vector<2x16xf32>
    %116 = vector.extract_strided_slice %86 {offsets = [0, 64], sizes = [16, 32], strides = [1, 1]} : vector<16x128xf32> to vector<16x32xf32>
    %cst_47 = arith.constant dense<0.000000e+00> : vector<8x16xf32>
    %117 = tpu.matmul %103, %116, %cst_47 {dimension_numbers = #tpu.dot_dimension_numbers<[1], [1], [0], [0], [0, 0, 1, 0], [], []>} : vector<8x32xf32>, vector<16x32xf32>, vector<8x16xf32> -> vector<8x16xf32>
    %cst_48 = arith.constant dense<0.000000e+00> : vector<2x16xf32>
    %118 = tpu.matmul %2, %116, %cst_48 {dimension_numbers = #tpu.dot_dimension_numbers<[1], [1], [0], [0], [0, 0, 1, 0], [], []>} : vector<2x32xf32>, vector<16x32xf32>, vector<2x16xf32> -> vector<2x16xf32>
    %119 = vector.extract_strided_slice %86 {offsets = [0, 96], sizes = [16, 32], strides = [1, 1]} : vector<16x128xf32> to vector<16x32xf32>
    %cst_49 = arith.constant dense<0.000000e+00> : vector<8x16xf32>
    %120 = tpu.matmul %103, %119, %cst_49 {dimension_numbers = #tpu.dot_dimension_numbers<[1], [1], [0], [0], [0, 0, 1, 0], [], []>} : vector<8x32xf32>, vector<16x32xf32>, vector<8x16xf32> -> vector<8x16xf32>
    %cst_50 = arith.constant dense<0.000000e+00> : vector<2x16xf32>
    %121 = tpu.matmul %2, %119, %cst_50 {dimension_numbers = #tpu.dot_dimension_numbers<[1], [1], [0], [0], [0, 0, 1, 0], [], []>} : vector<2x32xf32>, vector<16x32xf32>, vector<2x16xf32> -> vector<2x16xf32>
    %122 = tpu.concatenate %111, %114, %117, %120 in 1 : vector<8x16xf32>, vector<8x16xf32>, vector<8x16xf32>, vector<8x16xf32> -> vector<8x64xf32>
    %123 = tpu.concatenate %112, %115, %118, %121 in 1 : vector<2x16xf32>, vector<2x16xf32>, vector<2x16xf32>, vector<2x16xf32> -> vector<2x64xf32>
    %124 = vector.extract_strided_slice %4 {offsets = [48, 0], sizes = [16, 128], strides = [1, 1]} : vector<64x128xf32> to vector<16x128xf32>
    %cst_51 = arith.constant 0.000000e+00 : f32
    %125 = vector.broadcast %cst_51 : f32 to vector<8x32xf32>
    %126 = vector.extract_strided_slice %1 {offsets = [0, 0], sizes = [8, 16], strides = [1, 1]} : vector<8x64xf32> to vector<8x16xf32>
    %127 = vector.extract_strided_slice %124 {offsets = [0, 0], sizes = [16, 32], strides = [1, 1]} : vector<16x128xf32> to vector<16x32xf32>
    %cst_52 = arith.constant dense<0.000000e+00> : vector<8x32xf32>
    %128 = tpu.matmul %126, %127, %cst_52 {dimension_numbers = #tpu.dot_dimension_numbers<[1], [0], [0], [1], [0, 0, 1, 1], [], []>} : vector<8x16xf32>, vector<16x32xf32>, vector<8x32xf32> -> vector<8x32xf32>
    %129 = arith.addf %125, %128 : vector<8x32xf32>
    %130 = vector.extract_strided_slice %1 {offsets = [0, 16], sizes = [8, 16], strides = [1, 1]} : vector<8x64xf32> to vector<8x16xf32>
    %131 = vector.extract_strided_slice %124 {offsets = [0, 32], sizes = [16, 32], strides = [1, 1]} : vector<16x128xf32> to vector<16x32xf32>
    %cst_53 = arith.constant dense<0.000000e+00> : vector<8x32xf32>
    %132 = tpu.matmul %130, %131, %cst_53 {dimension_numbers = #tpu.dot_dimension_numbers<[1], [0], [0], [1], [0, 0, 1, 1], [], []>} : vector<8x16xf32>, vector<16x32xf32>, vector<8x32xf32> -> vector<8x32xf32>
    %133 = arith.addf %129, %132 : vector<8x32xf32>
    %134 = vector.extract_strided_slice %1 {offsets = [0, 32], sizes = [8, 16], strides = [1, 1]} : vector<8x64xf32> to vector<8x16xf32>
    %135 = vector.extract_strided_slice %124 {offsets = [0, 64], sizes = [16, 32], strides = [1, 1]} : vector<16x128xf32> to vector<16x32xf32>
    %cst_54 = arith.constant dense<0.000000e+00> : vector<8x32xf32>
    %136 = tpu.matmul %134, %135, %cst_54 {dimension_numbers = #tpu.dot_dimension_numbers<[1], [0], [0], [1], [0, 0, 1, 1], [], []>} : vector<8x16xf32>, vector<16x32xf32>, vector<8x32xf32> -> vector<8x32xf32>
    %137 = arith.addf %133, %136 : vector<8x32xf32>
    %138 = vector.extract_strided_slice %1 {offsets = [0, 48], sizes = [8, 16], strides = [1, 1]} : vector<8x64xf32> to vector<8x16xf32>
    %139 = vector.extract_strided_slice %124 {offsets = [0, 96], sizes = [16, 32], strides = [1, 1]} : vector<16x128xf32> to vector<16x32xf32>
    %cst_55 = arith.constant dense<0.000000e+00> : vector<8x32xf32>
    %140 = tpu.matmul %138, %139, %cst_55 {dimension_numbers = #tpu.dot_dimension_numbers<[1], [0], [0], [1], [0, 0, 1, 1], [], []>} : vector<8x16xf32>, vector<16x32xf32>, vector<8x32xf32> -> vector<8x32xf32>
    %141 = arith.addf %137, %140 : vector<8x32xf32>
    %142 = arith.mulf %141, %141 : vector<8x32xf32>
    %143 = vector.shape_cast %142 : vector<8x32xf32> to vector<1x8x32xf32>
    %cst_56 = arith.constant dense<0.000000e+00> : vector<1xf32>
    %144 = vector.multi_reduction <add>, %143, %cst_56 [1, 2] : vector<1x8x32xf32> to vector<1xf32>
    %145 = vector.shape_cast %144 : vector<1xf32> to vector<1x1x1xf32>
    %146 = vector.extract %145[0, 0, 0] : f32 from vector<1x1x1xf32>
    %147 = arith.addf %109, %146 : f32
    %148 = vector.extract_strided_slice %124 {offsets = [0, 0], sizes = [16, 32], strides = [1, 1]} : vector<16x128xf32> to vector<16x32xf32>
    %cst_57 = arith.constant dense<0.000000e+00> : vector<8x16xf32>
    %149 = tpu.matmul %141, %148, %cst_57 {dimension_numbers = #tpu.dot_dimension_numbers<[1], [1], [0], [0], [0, 0, 1, 0], [], []>} : vector<8x32xf32>, vector<16x32xf32>, vector<8x16xf32> -> vector<8x16xf32>
    %cst_58 = arith.constant dense<0.000000e+00> : vector<2x16xf32>
    %150 = tpu.matmul %2, %148, %cst_58 {dimension_numbers = #tpu.dot_dimension_numbers<[1], [1], [0], [0], [0, 0, 1, 0], [], []>} : vector<2x32xf32>, vector<16x32xf32>, vector<2x16xf32> -> vector<2x16xf32>
    %151 = vector.extract_strided_slice %124 {offsets = [0, 32], sizes = [16, 32], strides = [1, 1]} : vector<16x128xf32> to vector<16x32xf32>
    %cst_59 = arith.constant dense<0.000000e+00> : vector<8x16xf32>
    %152 = tpu.matmul %141, %151, %cst_59 {dimension_numbers = #tpu.dot_dimension_numbers<[1], [1], [0], [0], [0, 0, 1, 0], [], []>} : vector<8x32xf32>, vector<16x32xf32>, vector<8x16xf32> -> vector<8x16xf32>
    %cst_60 = arith.constant dense<0.000000e+00> : vector<2x16xf32>
    %153 = tpu.matmul %2, %151, %cst_60 {dimension_numbers = #tpu.dot_dimension_numbers<[1], [1], [0], [0], [0, 0, 1, 0], [], []>} : vector<2x32xf32>, vector<16x32xf32>, vector<2x16xf32> -> vector<2x16xf32>
    %154 = vector.extract_strided_slice %124 {offsets = [0, 64], sizes = [16, 32], strides = [1, 1]} : vector<16x128xf32> to vector<16x32xf32>
    %cst_61 = arith.constant dense<0.000000e+00> : vector<8x16xf32>
    %155 = tpu.matmul %141, %154, %cst_61 {dimension_numbers = #tpu.dot_dimension_numbers<[1], [1], [0], [0], [0, 0, 1, 0], [], []>} : vector<8x32xf32>, vector<16x32xf32>, vector<8x16xf32> -> vector<8x16xf32>
    %cst_62 = arith.constant dense<0.000000e+00> : vector<2x16xf32>
    %156 = tpu.matmul %2, %154, %cst_62 {dimension_numbers = #tpu.dot_dimension_numbers<[1], [1], [0], [0], [0, 0, 1, 0], [], []>} : vector<2x32xf32>, vector<16x32xf32>, vector<2x16xf32> -> vector<2x16xf32>
    %157 = vector.extract_strided_slice %124 {offsets = [0, 96], sizes = [16, 32], strides = [1, 1]} : vector<16x128xf32> to vector<16x32xf32>
    %cst_63 = arith.constant dense<0.000000e+00> : vector<8x16xf32>
    %158 = tpu.matmul %141, %157, %cst_63 {dimension_numbers = #tpu.dot_dimension_numbers<[1], [1], [0], [0], [0, 0, 1, 0], [], []>} : vector<8x32xf32>, vector<16x32xf32>, vector<8x16xf32> -> vector<8x16xf32>
    %cst_64 = arith.constant dense<0.000000e+00> : vector<2x16xf32>
    %159 = tpu.matmul %2, %157, %cst_64 {dimension_numbers = #tpu.dot_dimension_numbers<[1], [1], [0], [0], [0, 0, 1, 0], [], []>} : vector<2x32xf32>, vector<16x32xf32>, vector<2x16xf32> -> vector<2x16xf32>
    %160 = tpu.concatenate %149, %152, %155, %158 in 1 : vector<8x16xf32>, vector<8x16xf32>, vector<8x16xf32>, vector<8x16xf32> -> vector<8x64xf32>
    %161 = tpu.concatenate %150, %153, %156, %159 in 1 : vector<2x16xf32>, vector<2x16xf32>, vector<2x16xf32>, vector<2x16xf32> -> vector<2x64xf32>
    %162 = math.sqrt %9 : f32
    %cst_65 = arith.constant 1.000000e-10 : f32
    %163 = arith.addf %162, %cst_65 : f32
    %cst_66 = arith.constant 1.000000e+00 : f32
    %164 = arith.divf %cst_66, %163 : f32
    %165 = math.sqrt %147 : f32
    %cst_67 = arith.constant 1.000000e-10 : f32
    %166 = arith.addf %165, %cst_67 : f32
    %cst_68 = arith.constant 1.000000e+00 : f32
    %167 = arith.divf %cst_68, %166 : f32
    %168 = arith.mulf %164, %167 : f32
    %cst_69 = arith.constant 0.000000e+00 : f32
    %169 = vector.broadcast %cst_69 : f32 to vector<8x64xf32>
    %170 = vector.broadcast %164 : f32 to vector<2x64xf32>
    %171 = arith.mulf %47, %170 : vector<2x64xf32>
    %cst_70 = arith.constant 0.000000e+00 : f32
    %172 = vector.broadcast %cst_70 : f32 to vector<2x64xf32>
    %173 = arith.subf %172, %171 : vector<2x64xf32>
    %174 = math.exp %173 : vector<2x64xf32>
    %cst_71 = arith.constant 1.000000e+00 : f32
    %175 = vector.broadcast %cst_71 : f32 to vector<2x64xf32>
    %176 = arith.addf %175, %174 : vector<2x64xf32>
    %cst_72 = arith.constant 1.000000e+00 : f32
    %177 = vector.broadcast %cst_72 : f32 to vector<2x64xf32>
    %178 = arith.divf %177, %176 : vector<2x64xf32>
    %179 = vector.extract_strided_slice %178 {offsets = [0, 0], sizes = [1, 64], strides = [1, 1]} : vector<2x64xf32> to vector<1x64xf32>
    %180 = vector.extract_strided_slice %178 {offsets = [1, 0], sizes = [1, 64], strides = [1, 1]} : vector<2x64xf32> to vector<1x64xf32>
    %cst_73 = arith.constant 1.000000e-30 : f32
    %181 = vector.broadcast %cst_73 : f32 to vector<1x64xf32>
    %182 = arith.maximumf %180, %181 : vector<1x64xf32>
    %183 = vector.broadcast %168 : f32 to vector<8x64xf32>
    %184 = arith.mulf %46, %183 : vector<8x64xf32>
    %185 = vector.broadcast %179 : vector<1x64xf32> to vector<8x64xf32>
    %186 = arith.subf %184, %185 : vector<8x64xf32>
    %187 = arith.mulf %186, %186 : vector<8x64xf32>
    %cst_74 = arith.constant -1.000000e-01 : f32
    %188 = vector.broadcast %cst_74 : f32 to vector<1x64xf32>
    %189 = arith.mulf %188, %182 : vector<1x64xf32>
    %190 = vector.broadcast %189 : vector<1x64xf32> to vector<8x64xf32>
    %191 = arith.divf %187, %190 : vector<8x64xf32>
    %192 = math.exp %191 : vector<8x64xf32>
    %cst_75 = arith.constant 4.000000e+00 : f32
    %193 = vector.broadcast %cst_75 : f32 to vector<8x64xf32>
    %194 = arith.mulf %192, %193 : vector<8x64xf32>
    %cst_76 = arith.constant dense<0xFF800000> : vector<64xf32>
    %195 = vector.multi_reduction <maximumf>, %194, %cst_76 [0] : vector<8x64xf32> to vector<64xf32>
    %196 = vector.shape_cast %195 : vector<64xf32> to vector<1x64xf32>
    %197 = vector.broadcast %196 : vector<1x64xf32> to vector<8x64xf32>
    %198 = arith.subf %194, %197 : vector<8x64xf32>
    %199 = math.exp %198 : vector<8x64xf32>
    %cst_77 = arith.constant dense<0.000000e+00> : vector<64xf32>
    %200 = vector.multi_reduction <add>, %199, %cst_77 [0] : vector<8x64xf32> to vector<64xf32>
    %201 = vector.shape_cast %200 : vector<64xf32> to vector<1x64xf32>
    %202 = tpu.reciprocal %201 {approx = true} : vector<1x64xf32> -> vector<1x64xf32>
    %203 = vector.broadcast %202 : vector<1x64xf32> to vector<8x64xf32>
    %204 = arith.mulf %199, %203 : vector<8x64xf32>
    %205 = arith.addf %169, %204 : vector<8x64xf32>
    %206 = vector.broadcast %164 : f32 to vector<2x64xf32>
    %207 = arith.mulf %85, %206 : vector<2x64xf32>
    %cst_78 = arith.constant 0.000000e+00 : f32
    %208 = vector.broadcast %cst_78 : f32 to vector<2x64xf32>
    %209 = arith.subf %208, %207 : vector<2x64xf32>
    %210 = math.exp %209 : vector<2x64xf32>
    %cst_79 = arith.constant 1.000000e+00 : f32
    %211 = vector.broadcast %cst_79 : f32 to vector<2x64xf32>
    %212 = arith.addf %211, %210 : vector<2x64xf32>
    %cst_80 = arith.constant 1.000000e+00 : f32
    %213 = vector.broadcast %cst_80 : f32 to vector<2x64xf32>
    %214 = arith.divf %213, %212 : vector<2x64xf32>
    %215 = vector.extract_strided_slice %214 {offsets = [0, 0], sizes = [1, 64], strides = [1, 1]} : vector<2x64xf32> to vector<1x64xf32>
    %216 = vector.extract_strided_slice %214 {offsets = [1, 0], sizes = [1, 64], strides = [1, 1]} : vector<2x64xf32> to vector<1x64xf32>
    %cst_81 = arith.constant 1.000000e-30 : f32
    %217 = vector.broadcast %cst_81 : f32 to vector<1x64xf32>
    %218 = arith.maximumf %216, %217 : vector<1x64xf32>
    %219 = vector.broadcast %168 : f32 to vector<8x64xf32>
    %220 = arith.mulf %84, %219 : vector<8x64xf32>
    %221 = vector.broadcast %215 : vector<1x64xf32> to vector<8x64xf32>
    %222 = arith.subf %220, %221 : vector<8x64xf32>
    %223 = arith.mulf %222, %222 : vector<8x64xf32>
    %cst_82 = arith.constant -1.000000e-01 : f32
    %224 = vector.broadcast %cst_82 : f32 to vector<1x64xf32>
    %225 = arith.mulf %224, %218 : vector<1x64xf32>
    %226 = vector.broadcast %225 : vector<1x64xf32> to vector<8x64xf32>
    %227 = arith.divf %223, %226 : vector<8x64xf32>
    %228 = math.exp %227 : vector<8x64xf32>
    %cst_83 = arith.constant 4.000000e+00 : f32
    %229 = vector.broadcast %cst_83 : f32 to vector<8x64xf32>
    %230 = arith.mulf %228, %229 : vector<8x64xf32>
    %cst_84 = arith.constant dense<0xFF800000> : vector<64xf32>
    %231 = vector.multi_reduction <maximumf>, %230, %cst_84 [0] : vector<8x64xf32> to vector<64xf32>
    %232 = vector.shape_cast %231 : vector<64xf32> to vector<1x64xf32>
    %233 = vector.broadcast %232 : vector<1x64xf32> to vector<8x64xf32>
    %234 = arith.subf %230, %233 : vector<8x64xf32>
    %235 = math.exp %234 : vector<8x64xf32>
    %cst_85 = arith.constant dense<0.000000e+00> : vector<64xf32>
    %236 = vector.multi_reduction <add>, %235, %cst_85 [0] : vector<8x64xf32> to vector<64xf32>
    %237 = vector.shape_cast %236 : vector<64xf32> to vector<1x64xf32>
    %238 = tpu.reciprocal %237 {approx = true} : vector<1x64xf32> -> vector<1x64xf32>
    %239 = vector.broadcast %238 : vector<1x64xf32> to vector<8x64xf32>
    %240 = arith.mulf %235, %239 : vector<8x64xf32>
    %241 = arith.addf %205, %240 : vector<8x64xf32>
    %242 = vector.broadcast %164 : f32 to vector<2x64xf32>
    %243 = arith.mulf %123, %242 : vector<2x64xf32>
    %cst_86 = arith.constant 0.000000e+00 : f32
    %244 = vector.broadcast %cst_86 : f32 to vector<2x64xf32>
    %245 = arith.subf %244, %243 : vector<2x64xf32>
    %246 = math.exp %245 : vector<2x64xf32>
    %cst_87 = arith.constant 1.000000e+00 : f32
    %247 = vector.broadcast %cst_87 : f32 to vector<2x64xf32>
    %248 = arith.addf %247, %246 : vector<2x64xf32>
    %cst_88 = arith.constant 1.000000e+00 : f32
    %249 = vector.broadcast %cst_88 : f32 to vector<2x64xf32>
    %250 = arith.divf %249, %248 : vector<2x64xf32>
    %251 = vector.extract_strided_slice %250 {offsets = [0, 0], sizes = [1, 64], strides = [1, 1]} : vector<2x64xf32> to vector<1x64xf32>
    %252 = vector.extract_strided_slice %250 {offsets = [1, 0], sizes = [1, 64], strides = [1, 1]} : vector<2x64xf32> to vector<1x64xf32>
    %cst_89 = arith.constant 1.000000e-30 : f32
    %253 = vector.broadcast %cst_89 : f32 to vector<1x64xf32>
    %254 = arith.maximumf %252, %253 : vector<1x64xf32>
    %255 = vector.broadcast %168 : f32 to vector<8x64xf32>
    %256 = arith.mulf %122, %255 : vector<8x64xf32>
    %257 = vector.broadcast %251 : vector<1x64xf32> to vector<8x64xf32>
    %258 = arith.subf %256, %257 : vector<8x64xf32>
    %259 = arith.mulf %258, %258 : vector<8x64xf32>
    %cst_90 = arith.constant -1.000000e-01 : f32
    %260 = vector.broadcast %cst_90 : f32 to vector<1x64xf32>
    %261 = arith.mulf %260, %254 : vector<1x64xf32>
    %262 = vector.broadcast %261 : vector<1x64xf32> to vector<8x64xf32>
    %263 = arith.divf %259, %262 : vector<8x64xf32>
    %264 = math.exp %263 : vector<8x64xf32>
    %cst_91 = arith.constant 4.000000e+00 : f32
    %265 = vector.broadcast %cst_91 : f32 to vector<8x64xf32>
    %266 = arith.mulf %264, %265 : vector<8x64xf32>
    %cst_92 = arith.constant dense<0xFF800000> : vector<64xf32>
    %267 = vector.multi_reduction <maximumf>, %266, %cst_92 [0] : vector<8x64xf32> to vector<64xf32>
    %268 = vector.shape_cast %267 : vector<64xf32> to vector<1x64xf32>
    %269 = vector.broadcast %268 : vector<1x64xf32> to vector<8x64xf32>
    %270 = arith.subf %266, %269 : vector<8x64xf32>
    %271 = math.exp %270 : vector<8x64xf32>
    %cst_93 = arith.constant dense<0.000000e+00> : vector<64xf32>
    %272 = vector.multi_reduction <add>, %271, %cst_93 [0] : vector<8x64xf32> to vector<64xf32>
    %273 = vector.shape_cast %272 : vector<64xf32> to vector<1x64xf32>
    %274 = tpu.reciprocal %273 {approx = true} : vector<1x64xf32> -> vector<1x64xf32>
    %275 = vector.broadcast %274 : vector<1x64xf32> to vector<8x64xf32>
    %276 = arith.mulf %271, %275 : vector<8x64xf32>
    %277 = arith.addf %241, %276 : vector<8x64xf32>
    %278 = vector.broadcast %164 : f32 to vector<2x64xf32>
    %279 = arith.mulf %161, %278 : vector<2x64xf32>
    %cst_94 = arith.constant 0.000000e+00 : f32
    %280 = vector.broadcast %cst_94 : f32 to vector<2x64xf32>
    %281 = arith.subf %280, %279 : vector<2x64xf32>
    %282 = math.exp %281 : vector<2x64xf32>
    %cst_95 = arith.constant 1.000000e+00 : f32
    %283 = vector.broadcast %cst_95 : f32 to vector<2x64xf32>
    %284 = arith.addf %283, %282 : vector<2x64xf32>
    %cst_96 = arith.constant 1.000000e+00 : f32
    %285 = vector.broadcast %cst_96 : f32 to vector<2x64xf32>
    %286 = arith.divf %285, %284 : vector<2x64xf32>
    %287 = vector.extract_strided_slice %286 {offsets = [0, 0], sizes = [1, 64], strides = [1, 1]} : vector<2x64xf32> to vector<1x64xf32>
    %288 = vector.extract_strided_slice %286 {offsets = [1, 0], sizes = [1, 64], strides = [1, 1]} : vector<2x64xf32> to vector<1x64xf32>
    %cst_97 = arith.constant 1.000000e-30 : f32
    %289 = vector.broadcast %cst_97 : f32 to vector<1x64xf32>
    %290 = arith.maximumf %288, %289 : vector<1x64xf32>
    %291 = vector.broadcast %168 : f32 to vector<8x64xf32>
    %292 = arith.mulf %160, %291 : vector<8x64xf32>
    %293 = vector.broadcast %287 : vector<1x64xf32> to vector<8x64xf32>
    %294 = arith.subf %292, %293 : vector<8x64xf32>
    %295 = arith.mulf %294, %294 : vector<8x64xf32>
    %cst_98 = arith.constant -1.000000e-01 : f32
    %296 = vector.broadcast %cst_98 : f32 to vector<1x64xf32>
    %297 = arith.mulf %296, %290 : vector<1x64xf32>
    %298 = vector.broadcast %297 : vector<1x64xf32> to vector<8x64xf32>
    %299 = arith.divf %295, %298 : vector<8x64xf32>
    %300 = math.exp %299 : vector<8x64xf32>
    %cst_99 = arith.constant 4.000000e+00 : f32
    %301 = vector.broadcast %cst_99 : f32 to vector<8x64xf32>
    %302 = arith.mulf %300, %301 : vector<8x64xf32>
    %cst_100 = arith.constant dense<0xFF800000> : vector<64xf32>
    %303 = vector.multi_reduction <maximumf>, %302, %cst_100 [0] : vector<8x64xf32> to vector<64xf32>
    %304 = vector.shape_cast %303 : vector<64xf32> to vector<1x64xf32>
    %305 = vector.broadcast %304 : vector<1x64xf32> to vector<8x64xf32>
    %306 = arith.subf %302, %305 : vector<8x64xf32>
    %307 = math.exp %306 : vector<8x64xf32>
    %cst_101 = arith.constant dense<0.000000e+00> : vector<64xf32>
    %308 = vector.multi_reduction <add>, %307, %cst_101 [0] : vector<8x64xf32> to vector<64xf32>
    %309 = vector.shape_cast %308 : vector<64xf32> to vector<1x64xf32>
    %310 = tpu.reciprocal %309 {approx = true} : vector<1x64xf32> -> vector<1x64xf32>
    %311 = vector.broadcast %310 : vector<1x64xf32> to vector<8x64xf32>
    %312 = arith.mulf %307, %311 : vector<8x64xf32>
    %313 = arith.addf %277, %312 : vector<8x64xf32>
    %cst_102 = arith.constant 1.250000e+00 : f32
    %314 = vector.broadcast %cst_102 : f32 to vector<8x64xf32>
    %315 = arith.mulf %313, %314 : vector<8x64xf32>
    %c0_103 = arith.constant 0 : index
    %c0_104 = arith.constant 0 : index
    %316 = vector.load %arg2[%c0_103, %c0_104] : memref<64x16xf32, #tpu.memory_space<vmem>>, vector<64x16xf32>
    %cst_105 = arith.constant dense<0.000000e+00> : vector<8x16xf32>
    %317 = tpu.matmul %315, %316, %cst_105 {dimension_numbers = #tpu.dot_dimension_numbers<[1], [0], [0], [1], [0, 0, 1, 1], [], []>} : vector<8x64xf32>, vector<64x16xf32>, vector<8x16xf32> -> vector<8x16xf32>
    %c0_106 = arith.constant 0 : index
    %c0_107 = arith.constant 0 : index
    %318 = vector.load %arg6[%c0_106, %c0_107] : memref<16x32xf32, #tpu.memory_space<vmem>>, vector<16x32xf32>
    %cst_108 = arith.constant dense<0.000000e+00> : vector<8x32xf32>
    %319 = tpu.matmul %317, %318, %cst_108 {dimension_numbers = #tpu.dot_dimension_numbers<[1], [0], [0], [1], [0, 0, 1, 1], [], []>} : vector<8x16xf32>, vector<16x32xf32>, vector<8x32xf32> -> vector<8x32xf32>
    %c0_109 = arith.constant 0 : index
    %c0_110 = arith.constant 0 : index
    %320 = vector.load %arg7[%c0_109, %c0_110] : memref<1x32xf32, #tpu.memory_space<vmem>>, vector<1x32xf32>
    %321 = vector.extract_strided_slice %315 {offsets = [0, 0], sizes = [8, 16], strides = [1, 1]} : vector<8x64xf32> to vector<8x16xf32>
    %cst_111 = arith.constant dense<0.000000e+00> : vector<16x32xf32>
    %322 = tpu.matmul %321, %319, %cst_111 {dimension_numbers = #tpu.dot_dimension_numbers<[0], [0], [1], [1], [0, 1, 1, 1], [], []>} : vector<8x16xf32>, vector<8x32xf32>, vector<16x32xf32> -> vector<16x32xf32>
    %323 = vector.broadcast %320 : vector<1x32xf32> to vector<16x32xf32>
    %324 = arith.addf %322, %323 : vector<16x32xf32>
    %325 = vector.extract_strided_slice %315 {offsets = [0, 16], sizes = [8, 16], strides = [1, 1]} : vector<8x64xf32> to vector<8x16xf32>
    %cst_112 = arith.constant dense<0.000000e+00> : vector<16x32xf32>
    %326 = tpu.matmul %325, %319, %cst_112 {dimension_numbers = #tpu.dot_dimension_numbers<[0], [0], [1], [1], [0, 1, 1, 1], [], []>} : vector<8x16xf32>, vector<8x32xf32>, vector<16x32xf32> -> vector<16x32xf32>
    %327 = vector.broadcast %320 : vector<1x32xf32> to vector<16x32xf32>
    %328 = arith.addf %326, %327 : vector<16x32xf32>
    %329 = vector.extract_strided_slice %315 {offsets = [0, 32], sizes = [8, 16], strides = [1, 1]} : vector<8x64xf32> to vector<8x16xf32>
    %cst_113 = arith.constant dense<0.000000e+00> : vector<16x32xf32>
    %330 = tpu.matmul %329, %319, %cst_113 {dimension_numbers = #tpu.dot_dimension_numbers<[0], [0], [1], [1], [0, 1, 1, 1], [], []>} : vector<8x16xf32>, vector<8x32xf32>, vector<16x32xf32> -> vector<16x32xf32>
    %331 = vector.broadcast %320 : vector<1x32xf32> to vector<16x32xf32>
    %332 = arith.addf %330, %331 : vector<16x32xf32>
    %333 = vector.extract_strided_slice %315 {offsets = [0, 48], sizes = [8, 16], strides = [1, 1]} : vector<8x64xf32> to vector<8x16xf32>
    %cst_114 = arith.constant dense<0.000000e+00> : vector<16x32xf32>
    %334 = tpu.matmul %333, %319, %cst_114 {dimension_numbers = #tpu.dot_dimension_numbers<[0], [0], [1], [1], [0, 1, 1, 1], [], []>} : vector<8x16xf32>, vector<8x32xf32>, vector<16x32xf32> -> vector<16x32xf32>
    %335 = vector.broadcast %320 : vector<1x32xf32> to vector<16x32xf32>
    %336 = arith.addf %334, %335 : vector<16x32xf32>
    %337 = tpu.concatenate %324, %328, %332, %336 in 1 : vector<16x32xf32>, vector<16x32xf32>, vector<16x32xf32>, vector<16x32xf32> -> vector<16x128xf32>
    %c0_115 = arith.constant 0 : index
    %c0_116 = arith.constant 0 : index
    %338 = vector.load %arg8[%c0_115, %c0_116] : memref<16x128xf32, #tpu.memory_space<vmem>>, vector<16x128xf32>
    tpu.vector_store %arg8[%c0_115, %c0_116], %337 {strides = array<i32>} : memref<16x128xf32, #tpu.memory_space<vmem>>, vector<16x128xf32>,
    return
  }
  func.func @transform_0(%arg0: i32) -> (i32, i32) {
    %c0_i32 = arith.constant 0 : i32
    %c0_i32_0 = arith.constant 0 : i32
    %c0_i32_1 = arith.constant 0 : i32
    return %c0_i32, %c0_i32_0 : i32, i32
  }
  func.func @transform_1(%arg0: i32) -> (i32, i32) {
    %c0_i32 = arith.constant 0 : i32
    %c0_i32_0 = arith.constant 0 : i32
    %c0_i32_1 = arith.constant 0 : i32
    return %c0_i32, %c0_i32_0 : i32, i32
  }
  func.func @transform_2(%arg0: i32) -> (i32, i32) {
    %c0_i32 = arith.constant 0 : i32
    %c0_i32_0 = arith.constant 0 : i32
    %c0_i32_1 = arith.constant 0 : i32
    return %c0_i32, %c0_i32_0 : i32, i32
  }
  func.func @transform_3(%arg0: i32) -> (i32, i32) {
    %c0_i32 = arith.constant 0 : i32
    %c0_i32_0 = arith.constant 0 : i32
    %c0_i32_1 = arith.constant 0 : i32
    return %c0_i32, %c0_i32_0 : i32, i32
  }
  func.func @transform_4(%arg0: i32) -> (i32, i32) {
    %c0_i32 = arith.constant 0 : i32
    %c0_i32_0 = arith.constant 0 : i32
    %c0_i32_1 = arith.constant 0 : i32
    return %c0_i32, %c0_i32_0 : i32, i32
  }
  func.func @transform_5(%arg0: i32) -> (i32, i32) {
    %c0_i32 = arith.constant 0 : i32
    %c0_i32_0 = arith.constant 0 : i32
    %c0_i32_1 = arith.constant 0 : i32
    return %c0_i32, %c0_i32_0 : i32, i32
  }
  func.func @transform_6(%arg0: i32) -> (i32, i32) {
    %c0_i32 = arith.constant 0 : i32
    %c0_i32_0 = arith.constant 0 : i32
    %c0_i32_1 = arith.constant 0 : i32
    return %c0_i32, %c0_i32_0 : i32, i32
  }
  func.func @transform_7(%arg0: i32) -> (i32, i32) {
    %c0_i32 = arith.constant 0 : i32
    %c0_i32_0 = arith.constant 0 : i32
    %c0_i32_1 = arith.constant 0 : i32
    return %c0_i32, %c0_i32_0 : i32, i32
  }
}

</mosaic_0001>

<bundles_post_ra>
// kernel: tpu_custom_call.1
= control target key start
LH: loop header
LB: loop body
LE: loop exit
PB: predicated region body
PF: predicated region fallthrough
CT: control target
= control target key end

     0   :  { %vm39_vm0 = vcmask 130048   ;;  %s6642_s0 = inlined_call_operand.vmem [shape: f32[64,16], index: 0, kind: input, shape index: {}]   ;;  %s6643_s1 = inlined_call_operand.vmem [shape: f32[64,16], index: 1, kind: input, shape index: {}]   ;;  %s6644_s2 = inlined_call_operand.vmem [shape: f32[16,128], index: 2, kind: input, shape index: {}]   ;;  %s6645_s3 = inlined_call_operand.vmem [shape: f32[8,64], index: 3, kind: input, shape index: {}]   ;;  %s6646_s4 = inlined_call_operand.vmem [shape: f32[2,32], index: 4, kind: input, shape index: {}]   ;;  %s6647_s5 = inlined_call_operand.vmem [shape: f32[16,32], index: 5, kind: input, shape index: {}]   ;;  %s6648_s6 = inlined_call_operand.vmem [shape: f32[1,32], index: 6, kind: input, shape index: {}]   ;;  %s6649_s7 = inlined_call_operand.hbm [shape: f32[16,128], index: 7, kind: output, shape index: {}]  }
   0x1   :  { %v37_v0 = vld [vmem:[%s6644_s2] sm:$0xff]  ;;  %v38_v1 = vld [vmem:[%s6644_s2 + $0x8] sm:$0xff] }
   0x2   :  { %v27_v2 = vld [vmem:[%s6642_s0] sm:$0xff]  ;;  %v5497_v3 = vpack.c.bf16 %v38_v1, %v37_v0 }
   0x3   :  { %5103 = vmatprep.mubr.msk.f32.mxu0 %vm39_vm0, %v27_v2 }
   0x4   :  { %5498 = vmatprep.subr.bf16.mxu0 %v5497_v3 }
   0x5   :  { %12 = vsyncpa [#allocation3], 0  ;;  %5500 = vmatpush3.bf16.msra.mxu0 %v5497_v3  ;;  %v28_v4 = vld [vmem:[%s6642_s0 + $0x8] sm:$0xff]  ;;  %v29_v5 = vld [vmem:[%s6642_s0 + $0x10] sm:$0xff]  ;;  %v5887_v11 = vmov 0.0|0.0   ;;  %vm5888_vm1 = vmmov 0  }
   0x6   :  { %v30_v6 = vld [vmem:[%s6642_s0 + $0x18] sm:$0xff]  ;;  %v31_v7 = vld [vmem:[%s6642_s0 + $0x20] sm:$0xff]  ;;  %v32_v8 = vld [vmem:[%s6642_s0 + $0x28] sm:$0xff]  ;;  %5513 = vmatprep.subr.bf16.mxu0 %v5887_v11  ;;  %5501 = vmatprep.subr.bf16.mxu1 %v5887_v11  ;;  %v5889_v12 = vmov 0.0   ;;  %vm511_vm2 = vcmask 261120   ;;  %s5891_s20 = smov 96  }
   0x7   :  { %v33_v9 = vld [vmem:[%s6642_s0 + $0x30] sm:$0xff]  ;;  %v34_v10 = vld [vmem:[%s6642_s0 + $0x38] sm:$0xff]  ;;  %5119 = vmatprep.mubr.msk.f32.mxu1 %vm5888_vm1, %v5889_v12  ;;  %vm5988_vm3 = vmpackc.low %vm511_vm2, %vm511_vm2  ;;  %s5890_s0 = smov 64   ;;  %s5892_s23 = smov 112   ;;  %vm1119_vm8 = vcmask 392192   ;;  %vm3959_vm9 = vcmask 523264  }
   0x8   :  { %5104 = vmatmul.mubr.msk.f32.vlgmr.msra.gmra.mrb[0].mxu0 %vm39_vm0, %v28_v4  ;;  %v6000_v23 = vld [vmem:[%s6645_s3] sm:$0xff]  ;;  %s5893_s3 = smov 80   ;;  %s5894_s24 = smov 32   ;;  %vm4311_vm10 = vcmask 64512   ;;  %vm4769_vm11 = vcmask 785408  }
   0x9   :  { %5106 = vmatprep.mubr.msk.f32.mxu0 %vm39_vm0, %v29_v5  ;;  %v6078_v59 = vld [vmem:[%s6646_s4] sm:$0x3]  ;;  %s5895_s4 = smov 16   ;;  %s5896_s27 = smov 48  }
   0xc   :  { %5107 = vmatmul.mubr.msk.f32.gmra.mrb[2].mxu0 %vm39_vm0, %v30_v6 }
   0xd   :  { %5109 = vmatprep.mubr.msk.f32.mxu0 %vm39_vm0, %v31_v7 }
  0x10   :  { %5110 = vmatmul.mubr.msk.f32.gmra.mrb[4].mxu0 %vm39_vm0, %v32_v8 }
  0x11   :  { %5112 = vmatprep.mubr.msk.f32.mxu0 %vm39_vm0, %v33_v9 }
  0x14   :  { %5113 = vmatmul.mubr.msk.f32.gmra.mrb[6].mxu0 %vm39_vm0, %v34_v10 }
  0x15   :  { %5147 = vmatprep.mubr.msk.f32.mxu0 %vm5888_vm1, %v5889_v12 }
  0xdb   :  { %v5105_v13 = vpop.f32.mrb[0].mxu0 }
  0xdc   :  { %v170_v14 = vmul.f32 %v5105_v13, %v5105_v13  ;;  %v130_v15 = vpop.f32.mrb[1].mxu0 }
  0xdd   :  { %v169_v16 = vmul.f32 %v130_v15, %v130_v15  ;;  %v5984_v17 = vpack.c.bf16 %v5105_v13, %v130_v15  ;;  %v5752_v18 = vpack.i.bf16 %v5105_v13, %v130_v15 }
  0xdf   :  { %v177_v20 = vadd.f32 %v170_v14, %v169_v16  ;;  %5753 = vrot.lane.b32.xlu1 %v5752_v18, %s5890_s0  ;;  %5748 = vrot.lane.b32.xlu0 %v5752_v18, %s5891_s20  ;;  %v5108_v21 = vpop.f32.mrb[2].mxu0 }
  0xe0   :  { %5516 = vmatpush3.bf16.xpose.msk.msra.mxu0 %vm5988_vm3, %v5984_v17  ;;  %v140_v22 = vpop.f32.mrb[3].mxu0  ;;  %v172_v24 = vmul.f32 %v5108_v21, %v5108_v21 }
  0xe1   :  { %v171_v25 = vmul.f32 %v140_v22, %v140_v22  ;;  %v6002_v26 = vpack.c.bf16 %v5108_v21, %v140_v22  ;;  %v5767_v27 = vpack.i.bf16 %v5108_v21, %v140_v22  ;;  %5521 = vmatprep.subr.bf16.mxu0 %v5887_v11 }
  0xe3   :  { %v178_v28 = vadd.f32 %v177_v20, %v171_v25  ;;  %348 = vrot.lane.b32.xlu1 %v6000_v23, %s5891_s20  ;;  %194 = vrot.lane.b32.xlu0 %v6000_v23, %s5892_s23  ;;  %v6009_v29 = vpop.f32.mrb[4].mxu0 }
  0xe4   :  { %v6011_v30 = vpop.f32.mrb[5].mxu0  ;;  %v174_v31 = vmul.f32 %v6009_v29, %v6009_v29 }
  0xe5   :  { %v173_v32 = vmul.f32 %v6011_v30, %v6011_v30  ;;  %v5777_v33 = vpack.i.bf16 %v6009_v29, %v6011_v30  ;;  %v179_v34 = vadd.f32 %v178_v28, %v172_v24  ;;  %v6151_v20 = vpack.c.bf16 %v6009_v29, %v6011_v30 }
  0xe7   :  { %429 = vrot.lane.b32.xlu1 %v6000_v23, %s5893_s3  ;;  %5758 = vrot.lane.b32.xlu0 %v5752_v18, %s5894_s24  ;;  %v6022_v35 = vpop.f32.mrb[6].mxu0  ;;  %v180_v36 = vadd.f32 %v179_v34, %v173_v32 }
  0xe8   :  { %v6024_v37 = vpop.f32.mrb[7].mxu0  ;;  %v176_v40 = vmul.f32 %v6022_v35, %v6022_v35 }
  0xe9   :  { %v5797_v38 = vpack.i.bf16 %v6022_v35, %v6024_v37  ;;  %v175_v39 = vmul.f32 %v6024_v37, %v6024_v37  ;;  %v181_v41 = vadd.f32 %v180_v36, %v174_v31  ;;  %v6179_v28 = vpack.c.bf16 %v6022_v35, %v6024_v37 }
  0xeb   :  { %5768 = vrot.lane.b32.xlu1 %v5767_v27, %s5890_s0  ;;  %v182_v42 = vadd.f32 %v181_v41, %v175_v39  ;;  %5763 = vrot.lane.b32.xlu0 %v5767_v27, %s5891_s20 }
  0xed   :  { %v183_v43 = vadd.f32 %v182_v42, %v176_v40 }
  0xef   :  { %5778 = vrot.lane.b32.xlu1 %v5777_v33, %s5891_s20  ;;  %5773 = vrot.lane.b32.xlu0 %v5767_v27, %s5894_s24 }
  0xf3   :  { %5788 = vrot.lane.b32.xlu1 %v5777_v33, %s5894_s24  ;;  %5783 = vrot.lane.b32.xlu0 %v5777_v33, %s5890_s0 }
  0xf7   :  { %5798 = vrot.lane.b32.xlu1 %v5797_v38, %s5890_s0  ;;  %5793 = vrot.lane.b32.xlu0 %v5797_v38, %s5891_s20 }
  0xfb   :  { %5803 = vrot.lane.b32.xlu0 %v5797_v38, %s5894_s24 }
 0x11b   :  { %184 = vadd.xlane.f32.xlu1 %v183_v43 }
 0x151   :  { %v5749_v44 = vpop.permute.xlu0 %5748  ;;  %v5754_v49 = vpop.permute.xlu1 %5753 }
 0x152   :  { %v5751_v45 = vunpack.i.h.bf16 %v5749_v44  ;;  %v5750_v46 = vunpack.i.l.bf16 %v5749_v44  ;;  %v5756_v50 = vunpack.i.h.bf16 %v5754_v49  ;;  %v5755_v51 = vunpack.i.l.bf16 %v5754_v49 }
 0x154   :  { %v6038_v47 = vpack.c.bf16 %v5751_v45, %v5750_v46  ;;  %v5508_v52 = vpack.c.bf16 %v5756_v50, %v5755_v51 }
 0x155   :  { %v6042_v48 = vpop.permute.xlu0 %194  ;;  %v6055_v56 = vpop.permute.xlu1 %348 }
 0x156   :  { %5503 = vmatpush3.bf16.msra.mxu1 %v6038_v47 }
 0x157   :  { %5504 = vmatprep.subr.bf16.mxu1 %v5887_v11 }
 0x159   :  { %5120 = vmatmul.mubr.msk.f32.vlgmr.msra.gmra.mrb[0].mxu1 %vm39_vm0, %v6042_v48  ;;  %v5759_v53 = vpop.permute.xlu0 %5758  ;;  %v6063_v58 = vpop.permute.xlu1 %429 }
 0x15a   :  { %5506 = vmatpush3.bf16.msra.mxu1 %v5984_v17  ;;  %5126 = vmatprep.mubr.msk.f32.mxu1 %vm5888_vm1, %v5889_v12  ;;  %v5761_v54 = vunpack.i.h.bf16 %v5759_v53  ;;  %v5760_v55 = vunpack.i.l.bf16 %v5759_v53 }
 0x15b   :  { %5507 = vmatprep.subr.bf16.mxu1 %v5887_v11 }
 0x15c   :  { %v5511_v57 = vpack.c.bf16 %v5761_v54, %v5760_v55 }
 0x15d   :  { %v5769_v60 = vpop.permute.xlu1 %5768  ;;  %v5764_v13 = vpop.permute.xlu0 %5763 }
 0x15e   :  { %v5766_v14 = vunpack.i.h.bf16 %v5764_v13  ;;  %v5765_v15 = vunpack.i.l.bf16 %v5764_v13  ;;  %v5770_v18 = vunpack.i.l.bf16 %v5769_v60 }
 0x160   :  { %v6136_v16 = vpack.c.bf16 %v5766_v14, %v5765_v15 }
 0x161   :  { %5127 = vmatmul.mubr.msk.f32.vlgmr.msra.gmra.mrb[0].mxu1 %vm39_vm0, %v6000_v23  ;;  %v6110_v61 = vpop.permute.xlu1 %5778  ;;  %v5774_v22 = vpop.permute.xlu0 %5773 }
 0x162   :  { %5509 = vmatpush3.bf16.msra.mxu1 %v5508_v52  ;;  %5133 = vmatprep.mubr.msk.f32.mxu1 %vm5888_vm1, %v5889_v12  ;;  %v5776_v24 = vunpack.i.h.bf16 %v5774_v22  ;;  %v5775_v25 = vunpack.i.l.bf16 %v5774_v22 }
 0x163   :  { %5510 = vmatprep.subr.bf16.mxu1 %v5887_v11 }
 0x164   :  { %v6161_v27 = vpack.c.bf16 %v5776_v24, %v5775_v25 }
 0x165   :  { %v6112_v62 = vpop.permute.xlu1 %5788  ;;  %v5784_v29 = vpop.permute.xlu0 %5783 }
 0x166   :  { %v5786_v54 = vunpack.i.h.bf16 %v5784_v29  ;;  %v5785_v55 = vunpack.i.l.bf16 %v5784_v29 }
 0x169   :  { %5134 = vmatmul.mubr.msk.f32.vlgmr.msra.gmra.mrb[0].mxu1 %vm39_vm0, %v6055_v56  ;;  %v6114_v63 = vpop.permute.xlu1 %5798  ;;  %v6181_v30 = vpop.permute.xlu0 %5793 }
 0x16a   :  { %5512 = vmatpush3.bf16.msra.mxu1 %v5511_v57  ;;  %5140 = vmatprep.mubr.msk.f32.mxu1 %vm5888_vm1, %v5889_v12 }
 0x16b   :  { %5517 = vmatprep.subr.bf16.mxu1 %v5887_v11 }
 0x16d   :  { %v6183_v31 = vpop.permute.xlu0 %5803 }
 0x171   :  { %5141 = vmatmul.mubr.msk.f32.vlgmr.msra.gmra.mrb[0].mxu1 %vm39_vm0, %v6063_v58 }
 0x172   :  { %5154 = vmatprep.mubr.msk.f32.mxu1 %vm5888_vm1, %v5889_v12 }
 0x173   :  { %5520 = vmatpush3.bf16.xpose.msk.msra.mxu1 %vm5988_vm3, %v5984_v17  ;;  %v5771_v17 = vunpack.i.h.bf16 %v5769_v60 }
 0x174   :  { %5525 = vmatprep.subr.bf16.mxu1 %v5887_v11 }
 0x175   :  { %v6153_v21 = vpack.c.bf16 %v5771_v17, %v5770_v18 }
 0x17a   :  { %5155 = vmatmul.mubr.msk.f32.vlgmr.msra.gmra.mrb[2].mxu1 %vm511_vm2, %v6078_v59 }
 0x17b   :  { %5528 = vmatpush3.bf16.xpose.msk.msra.mxu1 %vm5988_vm3, %v6038_v47  ;;  %5168 = vmatprep.mubr.msk.f32.mxu1 %vm5888_vm1, %v5889_v12 }
 0x17c   :  { %5533 = vmatprep.subr.bf16.mxu1 %v5887_v11 }
 0x182   :  { %5169 = vmatmul.mubr.msk.f32.vlgmr.msra.gmra.mrb[4].mxu1 %vm511_vm2, %v6078_v59 }
 0x183   :  { %5536 = vmatpush3.bf16.xpose.msk.msra.mxu1 %vm5988_vm3, %v5508_v52  ;;  %5182 = vmatprep.mubr.msk.f32.mxu1 %vm5888_vm1, %v5889_v12 }
 0x184   :  { %5541 = vmatprep.subr.bf16.mxu1 %v5887_v11 }
 0x18a   :  { %5183 = vmatmul.mubr.msk.f32.vlgmr.msra.gmra.mrb[6].mxu1 %vm511_vm2, %v6078_v59 }
 0x18b   :  { %5544 = vmatpush3.bf16.xpose.msk.msra.mxu1 %vm5988_vm3, %v5511_v57  ;;  %5196 = vmatprep.mubr.msk.f32.mxu1 %vm5888_vm1, %v5889_v12 }
 0x18c   :  { %5557 = vmatprep.subr.bf16.mxu1 %v5887_v11 }
 0x192   :  { %5197 = vmatmul.mubr.msk.f32.vlgmr.msra.gmra.mrb[8].mxu1 %vm511_vm2, %v6078_v59 }
 0x193   :  { %5560 = vmatpush3.bf16.xpose.msk.msra.mxu1 %vm5988_vm3, %v6002_v26  ;;  %5231 = vmatprep.mubr.msk.f32.mxu1 %vm5888_vm1, %v5889_v12 }
 0x194   :  { %5561 = vmatprep.subr.bf16.mxu1 %v5887_v11 }
 0x1a8   :  { %v185_v0 = vpop.xlane.xlu1 %184 }
 0x1a9   :  { %v186_v1 = vrot.slane %v185_v0, 4 }
 0x1ab   :  { %v187_v2 = vadd.f32 %v186_v1, %v185_v0  ;;  %v5791_v0 = vunpack.i.h.bf16 %v6112_v62  ;;  %v5790_v1 = vunpack.i.l.bf16 %v6112_v62 }
 0x1ad   :  { %v188_v3 = vrot.slane %v187_v2, 2 }
 0x1af   :  { %v189_v4 = vadd.f32 %v188_v3, %v187_v2 }
 0x1b1   :  { %v190_v5 = vrot.slane %v189_v4, 1 }
 0x1b3   :  { %v191_v6 = vadd.f32 %v190_v5, %v189_v4  ;;  %v6276_v4 = vpack.c.bf16 %v5791_v0, %v5790_v1 }
 0x1b5   :  { %5716 = vpush %v191_v6 }
 0x1e6   :  { %s5717_s28 = spop %5716 }
 0x1e7   :  { %v3905_v19 = vstv %s5717_s28 }
 0x1e8   :  { %5807 = vrsqrt.f32 %v3905_v19  ;;  %vm3908_vm4 = vcmp.eq.f32.partialorder %v3905_v19, inf  ;;  %vm3910_vm5 = vcmp.eq.f32.partialorder %v3905_v19, 0.0 }
 0x244   :  { %v505_v7 = vpop.f32.mrb[0].mxu1 }
 0x245   :  { %v5142_v8 = vpop.f32.mrb[1].mxu1  ;;  %5148 = vmatmul.mubr.msk.f32.vlgmr.msra.gmra.mrb[8].mxu0 %vm511_vm2, %v505_v7  ;;  %v510_v9 = vmul.f32 %v505_v7, %v505_v7 }
 0x246   :  { %5524 = vmatpush3.bf16.xpose.msk.msra.mxu0 %vm5988_vm3, %v6038_v47  ;;  %5161 = vmatprep.mubr.msk.f32.mxu0 %vm5888_vm1, %v5889_v12 }
 0x247   :  { %v512_v10 = vsel %vm511_vm2, %v510_v9, 0.0  ;;  %5529 = vmatprep.subr.bf16.mxu0 %v5887_v11 }
 0x248   :  { %513 = vadd.xlane.f32.xlu0 %v512_v10 }
 0x24d   :  { %5162 = vmatmul.mubr.msk.f32.vlgmr.msra.gmra.mrb[10].mxu0 %vm511_vm2, %v505_v7  ;;  %v6261_v60 = vpop.f32.mrb[2].mxu1 }
 0x24e   :  { %5532 = vmatpush3.bf16.xpose.msk.msra.mxu0 %vm5988_vm3, %v5508_v52  ;;  %5175 = vmatprep.mubr.msk.f32.mxu0 %vm5888_vm1, %v5889_v12  ;;  %v5780_v52 = vunpack.i.l.bf16 %v6110_v61 }
 0x24f   :  { %5537 = vmatprep.subr.bf16.mxu0 %v5887_v11 }
 0x255   :  { %5176 = vmatmul.mubr.msk.f32.vlgmr.msra.gmra.mrb[12].mxu0 %vm511_vm2, %v505_v7 }
 0x256   :  { %5540 = vmatpush3.bf16.xpose.msk.msra.mxu0 %vm5988_vm3, %v5511_v57  ;;  %5189 = vmatprep.mubr.msk.f32.mxu0 %vm5888_vm1, %v5889_v12  ;;  %v6254_v57 = vpack.c.bf16 %v5786_v54, %v5785_v55 }
 0x257   :  { %5545 = vmatprep.subr.bf16.mxu0 %v5887_v11 }
 0x25d   :  { %5190 = vmatmul.mubr.msk.f32.vlgmr.msra.gmra.mrb[14].mxu0 %vm511_vm2, %v505_v7 }
 0x25e   :  { %5547 = vmatpush3.bf16.msra.mxu0 %v6136_v16  ;;  %5203 = vmatprep.mubr.msk.f32.mxu0 %vm5888_vm1, %v5889_v12 }
 0x25f   :  { %5548 = vmatprep.subr.bf16.mxu0 %v5887_v11 }
 0x261   :  { %5204 = vmatmul.mubr.msk.f32.vlgmr.msra.gmra.mrb[16].mxu0 %vm39_vm0, %v6042_v48 }
 0x262   :  { %5550 = vmatpush3.bf16.msra.mxu0 %v6002_v26  ;;  %5210 = vmatprep.mubr.msk.f32.mxu0 %vm5888_vm1, %v5889_v12 }
 0x263   :  { %5551 = vmatprep.subr.bf16.mxu0 %v5887_v11 }
 0x269   :  { %5211 = vmatmul.mubr.msk.f32.vlgmr.msra.gmra.mrb[16].mxu0 %vm39_vm0, %v6000_v23 }
 0x26a   :  { %5553 = vmatpush3.bf16.msra.mxu0 %v6153_v21  ;;  %5217 = vmatprep.mubr.msk.f32.mxu0 %vm5888_vm1, %v5889_v12 }
 0x26b   :  { %5554 = vmatprep.subr.bf16.mxu0 %v5887_v11 }
 0x271   :  { %5218 = vmatmul.mubr.msk.f32.vlgmr.msra.gmra.mrb[16].mxu0 %vm39_vm0, %v6055_v56 }
 0x272   :  { %5556 = vmatpush3.bf16.msra.mxu0 %v6161_v27  ;;  %5224 = vmatprep.mubr.msk.f32.mxu0 %vm5888_vm1, %v5889_v12 }
 0x273   :  { %5565 = vmatprep.subr.bf16.mxu0 %v5887_v11 }
 0x279   :  { %5225 = vmatmul.mubr.msk.f32.vlgmr.msra.gmra.mrb[16].mxu0 %vm39_vm0, %v6063_v58 }
 0x27a   :  { %5245 = vmatprep.mubr.msk.f32.mxu0 %vm5888_vm1, %v5889_v12 }
 0x27b   :  { %5568 = vmatpush3.bf16.xpose.msk.msra.mxu0 %vm5988_vm3, %v6136_v16 }
 0x27c   :  { %5573 = vmatprep.subr.bf16.mxu0 %v5887_v11 }
 0x2d5   :  { %v514_v32 = vpop.xlane.xlu0 %513 }
 0x2d6   :  { %v515_v33 = vrot.slane %v514_v32, 4 }
 0x2d8   :  { %v516_v34 = vadd.f32 %v515_v33, %v514_v32 }
 0x2da   :  { %v517_v36 = vrot.slane %v516_v34, 2 }
 0x2dc   :  { %v518_v38 = vadd.f32 %v517_v36, %v516_v34 }
 0x2de   :  { %v519_v39 = vrot.slane %v518_v38, 1 }
 0x2e0   :  { %v520_v40 = vadd.f32 %v519_v39, %v518_v38  ;;  %v5795_v38 = vunpack.i.l.bf16 %v6181_v30 }
 0x2e2   :  { %5718 = vpush %v520_v40  ;;  %v5800_v40 = vunpack.i.l.bf16 %v6114_v63 }
 0x313   :  { %s5719_s29 = spop %5718 }
 0x318   :  { %v6185_v41 = vpop.f32.mrb[8].mxu0 }
 0x319   :  { %v5149_v42 = vpop.f32.mrb[9].mxu0 }
 0x320   :  { %v6187_v43 = vpop.f32.mrb[10].mxu0 }
 0x321   :  { %v5163_v35 = vpop.f32.mrb[11].mxu0 }
 0x322   :  { %v5806_v35 = vunpack.i.h.bf16 %v6183_v31 }
 0x328   :  { %v6189_v37 = vpop.f32.mrb[12].mxu0 }
 0x329   :  { %v5177_v44 = vpop.f32.mrb[13].mxu0 }
 0x32a   :  { %v5805_v44 = vunpack.i.l.bf16 %v6183_v31 }
 0x330   :  { %v6191_v45 = vpop.f32.mrb[14].mxu0 }
 0x331   :  { %v5191_v46 = vpop.f32.mrb[15].mxu0 }
 0x34c   :  { %v1433_v47 = vpop.f32.mrb[16].mxu0 }
 0x34d   :  { %v5226_v49 = vpop.f32.mrb[17].mxu0  ;;  %5232 = vmatmul.mubr.msk.f32.vlgmr.msra.gmra.mrb[10].mxu1 %vm511_vm2, %v1433_v47  ;;  %5246 = vmatmul.mubr.msk.f32.vlgmr.msra.gmra.mrb[18].mxu0 %vm511_vm2, %v1433_v47  ;;  %v1438_v50 = vmul.f32 %v1433_v47, %v1433_v47 }
 0x34e   :  { %5564 = vmatpush3.bf16.xpose.msk.msra.mxu1 %vm5988_vm3, %v6002_v26  ;;  %5576 = vmatpush3.bf16.xpose.msk.msra.mxu0 %vm5988_vm3, %v6153_v21  ;;  %v5781_v26 = vunpack.i.h.bf16 %v6110_v61  ;;  %v5156_v61 = vpop.f32.mrb[3].mxu1 }
 0x34f   :  { %v1439_v51 = vsel %vm511_vm2, %v1438_v50, 0.0  ;;  %5259 = vmatprep.mubr.msk.f32.mxu0 %vm5888_vm1, %v5889_v12  ;;  %5238 = vmatprep.mubr.msk.f32.mxu1 %vm5888_vm1, %v5889_v12  ;;  %v6266_v2 = vpop.f32.mrb[4].mxu1 }
 0x350   :  { %1440 = vadd.xlane.f32.xlu0 %v1439_v51  ;;  %5569 = vmatprep.subr.bf16.mxu1 %v5887_v11  ;;  %v6225_v53 = vpack.c.bf16 %v5781_v26, %v5780_v52  ;;  %v5170_v3 = vpop.f32.mrb[5].mxu1 }
 0x351   :  { %5581 = vmatprep.subr.bf16.mxu0 %v5887_v11  ;;  %v6292_v62 = vpop.f32.mrb[6].mxu1 }
 0x352   :  { %v5184_v5 = vpop.f32.mrb[7].mxu1 }
 0x353   :  { %v6294_v6 = vpop.f32.mrb[8].mxu1 }
 0x354   :  { %v5198_v7 = vpop.f32.mrb[9].mxu1 }
 0x355   :  { %5260 = vmatmul.mubr.msk.f32.vlgmr.msra.gmra.mrb[20].mxu0 %vm511_vm2, %v1433_v47  ;;  %5239 = vmatmul.mubr.msk.f32.vlgmr.msra.gmra.mrb[12].mxu1 %vm511_vm2, %v6078_v59 }
 0x356   :  { %5572 = vmatpush3.bf16.xpose.msk.msra.mxu1 %vm5988_vm3, %v6136_v16  ;;  %5584 = vmatpush3.bf16.xpose.msk.msra.mxu0 %vm5988_vm3, %v6161_v27 }
 0x357   :  { %5273 = vmatprep.mubr.msk.f32.mxu0 %vm5888_vm1, %v5889_v12  ;;  %5252 = vmatprep.mubr.msk.f32.mxu1 %vm5888_vm1, %v5889_v12 }
 0x358   :  { %5577 = vmatprep.subr.bf16.mxu1 %v5887_v11  ;;  %5589 = vmatprep.subr.bf16.mxu0 %v5887_v11 }
 0x35d   :  { %5274 = vmatmul.mubr.msk.f32.vlgmr.msra.gmra.mrb[22].mxu0 %vm511_vm2, %v1433_v47  ;;  %5253 = vmatmul.mubr.msk.f32.vlgmr.msra.gmra.mrb[14].mxu1 %vm511_vm2, %v6078_v59  ;;  %v6389_v47 = vpack.c.bf16 %v5806_v35, %v5805_v44 }
 0x35e   :  { %5580 = vmatpush3.bf16.xpose.msk.msra.mxu1 %vm5988_vm3, %v6153_v21  ;;  %5591 = vmatpush3.bf16.msra.mxu0 %v6225_v53 }
 0x35f   :  { %5287 = vmatprep.mubr.msk.f32.mxu0 %vm5888_vm1, %v5889_v12  ;;  %5592 = vmatprep.subr.bf16.mxu0 %v5887_v11 }
 0x360   :  { %5266 = vmatprep.mubr.msk.f32.mxu1 %vm5888_vm1, %v5889_v12  ;;  %5585 = vmatprep.subr.bf16.mxu1 %v5887_v11 }
 0x361   :  { %5288 = vmatmul.mubr.msk.f32.vlgmr.msra.gmra.mrb[24].mxu0 %vm39_vm0, %v6042_v48 }
 0x362   :  { %5594 = vmatpush3.bf16.msra.mxu0 %v6151_v20  ;;  %5294 = vmatprep.mubr.msk.f32.mxu0 %vm5888_vm1, %v5889_v12 }
 0x363   :  { %5595 = vmatprep.subr.bf16.mxu0 %v5887_v11 }
 0x365   :  { %5267 = vmatmul.mubr.msk.f32.vlgmr.msra.gmra.mrb[16].mxu1 %vm511_vm2, %v6078_v59 }
 0x366   :  { %5588 = vmatpush3.bf16.xpose.msk.msra.mxu1 %vm5988_vm3, %v6161_v27  ;;  %5280 = vmatprep.mubr.msk.f32.mxu1 %vm5888_vm1, %v5889_v12 }
 0x367   :  { %5601 = vmatprep.subr.bf16.mxu1 %v5887_v11 }
 0x369   :  { %5295 = vmatmul.mubr.msk.f32.vlgmr.msra.gmra.mrb[24].mxu0 %vm39_vm0, %v6000_v23 }
 0x36a   :  { %5597 = vmatpush3.bf16.msra.mxu0 %v6254_v57  ;;  %5301 = vmatprep.mubr.msk.f32.mxu0 %vm5888_vm1, %v5889_v12 }
 0x36b   :  { %5598 = vmatprep.subr.bf16.mxu0 %v5887_v11 }
 0x36d   :  { %5281 = vmatmul.mubr.msk.f32.vlgmr.msra.gmra.mrb[18].mxu1 %vm511_vm2, %v6078_v59 }
 0x36e   :  { %5604 = vmatpush3.bf16.xpose.msk.msra.mxu1 %vm5988_vm3, %v6151_v20  ;;  %5315 = vmatprep.mubr.msk.f32.mxu1 %vm5888_vm1, %v5889_v12 }
 0x36f   :  { %5605 = vmatprep.subr.bf16.mxu1 %v5887_v11 }
 0x371   :  { %5302 = vmatmul.mubr.msk.f32.vlgmr.msra.gmra.mrb[24].mxu0 %vm39_vm0, %v6055_v56 }
 0x372   :  { %5600 = vmatpush3.bf16.msra.mxu0 %v6276_v4  ;;  %5308 = vmatprep.mubr.msk.f32.mxu0 %vm5888_vm1, %v5889_v12 }
 0x373   :  { %5609 = vmatprep.subr.bf16.mxu0 %v5887_v11 }
 0x379   :  { %5309 = vmatmul.mubr.msk.f32.vlgmr.msra.gmra.mrb[24].mxu0 %vm39_vm0, %v6063_v58 }
 0x37a   :  { %5329 = vmatprep.mubr.msk.f32.mxu0 %vm5888_vm1, %v5889_v12 }
 0x37b   :  { %5612 = vmatpush3.bf16.xpose.msk.msra.mxu0 %vm5988_vm3, %v6225_v53 }
 0x37c   :  { %5617 = vmatprep.subr.bf16.mxu0 %v5887_v11 }
 0x3dd   :  { %v1441_v8 = vpop.xlane.xlu0 %1440 }
 0x3de   :  { %v1442_v9 = vrot.slane %v1441_v8, 4 }
 0x3e0   :  { %v1443_v10 = vadd.f32 %v1442_v9, %v1441_v8 }
 0x3e2   :  { %v1444_v13 = vrot.slane %v1443_v10, 2 }
 0x3e4   :  { %v1445_v14 = vadd.f32 %v1444_v13, %v1443_v10 }
 0x3e6   :  { %v1446_v15 = vrot.slane %v1445_v14, 1 }
 0x3e8   :  { %v1447_v16 = vadd.f32 %v1446_v15, %v1445_v14 }
 0x3ea   :  { %5720 = vpush %v1447_v16 }
 0x41b   :  { %s5721_s30 = spop %5720 }
 0x41c   :  { %s1449_s9 = sadd.f32 %s5721_s30, %s5719_s29 }
 0x420   :  { %v6296_v17 = vpop.f32.mrb[10].mxu1  ;;  %v6298_v18 = vpop.f32.mrb[18].mxu0 }
 0x421   :  { %v5233_v21 = vpop.f32.mrb[11].mxu1  ;;  %v5247_v22 = vpop.f32.mrb[19].mxu0 }
 0x428   :  { %v6300_v24 = vpop.f32.mrb[20].mxu0 }
 0x429   :  { %v5261_v25 = vpop.f32.mrb[21].mxu0 }
 0x430   :  { %v6302_v27 = vpop.f32.mrb[22].mxu0 }
 0x431   :  { %v5275_v29 = vpop.f32.mrb[23].mxu0 }
 0x44c   :  { %v2356_v32 = vpop.f32.mrb[24].mxu0 }
 0x44d   :  { %v5310_v33 = vpop.f32.mrb[25].mxu0  ;;  %5316 = vmatmul.mubr.msk.f32.vlgmr.msra.gmra.mrb[20].mxu1 %vm511_vm2, %v2356_v32  ;;  %5330 = vmatmul.mubr.msk.f32.vlgmr.msra.gmra.mrb[26].mxu0 %vm511_vm2, %v2356_v32  ;;  %v2361_v34 = vmul.f32 %v2356_v32, %v2356_v32 }
 0x44e   :  { %5608 = vmatpush3.bf16.xpose.msk.msra.mxu1 %vm5988_vm3, %v6151_v20  ;;  %5620 = vmatpush3.bf16.xpose.msk.msra.mxu0 %vm5988_vm3, %v6254_v57  ;;  %v5796_v20 = vunpack.i.h.bf16 %v6181_v30  ;;  %v5801_v30 = vunpack.i.h.bf16 %v6114_v63  ;;  %v6374_v63 = vpop.f32.mrb[12].mxu1 }
 0x44f   :  { %v2362_v36 = vsel %vm511_vm2, %v2361_v34, 0.0  ;;  %5343 = vmatprep.mubr.msk.f32.mxu0 %vm5888_vm1, %v5889_v12  ;;  %5322 = vmatprep.mubr.msk.f32.mxu1 %vm5888_vm1, %v5889_v12  ;;  %v5240_v42 = vpop.f32.mrb[13].mxu1 }
 0x450   :  { %2363 = vadd.xlane.f32.xlu1 %v2362_v36  ;;  %5613 = vmatprep.subr.bf16.mxu1 %v5887_v11  ;;  %v6336_v39 = vpack.c.bf16 %v5796_v20, %v5795_v38  ;;  %v6379_v46 = vpop.f32.mrb[14].mxu1 }
 0x451   :  { %5625 = vmatprep.subr.bf16.mxu0 %v5887_v11 }
 0x455   :  { %5344 = vmatmul.mubr.msk.f32.vlgmr.msra.gmra.mrb[28].mxu0 %vm511_vm2, %v2356_v32  ;;  %5323 = vmatmul.mubr.msk.f32.vlgmr.msra.gmra.mrb[22].mxu1 %vm511_vm2, %v6078_v59 }
 0x456   :  { %5616 = vmatpush3.bf16.xpose.msk.msra.mxu1 %vm5988_vm3, %v6225_v53  ;;  %5628 = vmatpush3.bf16.xpose.msk.msra.mxu0 %vm5988_vm3, %v6276_v4 }
 0x457   :  { %5357 = vmatprep.mubr.msk.f32.mxu0 %vm5888_vm1, %v5889_v12  ;;  %5336 = vmatprep.mubr.msk.f32.mxu1 %vm5888_vm1, %v5889_v12 }
 0x458   :  { %5621 = vmatprep.subr.bf16.mxu1 %v5887_v11  ;;  %5633 = vmatprep.subr.bf16.mxu0 %v5887_v11 }
 0x45d   :  { %5358 = vmatmul.mubr.msk.f32.vlgmr.msra.gmra.mrb[30].mxu0 %vm511_vm2, %v2356_v32  ;;  %5337 = vmatmul.mubr.msk.f32.vlgmr.msra.gmra.mrb[24].mxu1 %vm511_vm2, %v6078_v59  ;;  %v5808_v32 = vpop.eup %5807 }
 0x45e   :  { %5624 = vmatpush3.bf16.xpose.msk.msra.mxu1 %vm5988_vm3, %v6254_v57  ;;  %5635 = vmatpush3.bf16.msra.mxu0 %v6336_v39  ;;  %v3907_v36 = vmul.f32 %v5808_v32, %v3905_v19 }
 0x45f   :  { %5371 = vmatprep.mubr.msk.f32.mxu0 %vm5888_vm1, %v5889_v12  ;;  %5636 = vmatprep.subr.bf16.mxu0 %v5887_v11 }
 0x460   :  { %5350 = vmatprep.mubr.msk.f32.mxu1 %vm5888_vm1, %v5889_v12  ;;  %5629 = vmatprep.subr.bf16.mxu1 %v5887_v11 }
 0x461   :  { %5372 = vmatmul.mubr.msk.f32.vlgmr.msra.gmra.mrb[32].mxu0 %vm39_vm0, %v6042_v48  ;;  %v6367_v48 = vpack.c.bf16 %v5801_v30, %v5800_v40  ;;  %1122 = vrot.lane.b32.xlu1 %v6266_v2, %s5895_s4 }
 0x462   :  { %5638 = vmatpush3.bf16.msra.mxu0 %v6179_v28  ;;  %5378 = vmatprep.mubr.msk.f32.mxu0 %vm5888_vm1, %v5889_v12 }
 0x463   :  { %5639 = vmatprep.subr.bf16.mxu0 %v5887_v11 }
 0x465   :  { %5351 = vmatmul.mubr.msk.f32.vlgmr.msra.gmra.mrb[26].mxu1 %vm511_vm2, %v6078_v59  ;;  %1126 = vrot.lane.b32.xlu1 %v6292_v62, %s5894_s24 }
 0x466   :  { %5632 = vmatpush3.bf16.xpose.msk.msra.mxu1 %vm5988_vm3, %v6276_v4  ;;  %5364 = vmatprep.mubr.msk.f32.mxu1 %vm5888_vm1, %v5889_v12 }
 0x467   :  { %5645 = vmatprep.subr.bf16.mxu1 %v5887_v11 }
 0x469   :  { %5379 = vmatmul.mubr.msk.f32.vlgmr.msra.gmra.mrb[32].mxu0 %vm39_vm0, %v6000_v23  ;;  %v5254_v23 = vpop.f32.mrb[15].mxu1 }
 0x46a   :  { %5641 = vmatpush3.bf16.msra.mxu0 %v6367_v48  ;;  %5385 = vmatprep.mubr.msk.f32.mxu0 %vm5888_vm1, %v5889_v12 }
 0x46b   :  { %5642 = vmatprep.subr.bf16.mxu0 %v5887_v11 }
 0x46d   :  { %5365 = vmatmul.mubr.msk.f32.vlgmr.msra.gmra.mrb[28].mxu1 %vm511_vm2, %v6078_v59 }
 0x46e   :  { %5648 = vmatpush3.bf16.xpose.msk.msra.mxu1 %vm5988_vm3, %v6179_v28  ;;  %5399 = vmatprep.mubr.msk.f32.mxu1 %vm5888_vm1, %v5889_v12 }
 0x46f   :  { %5649 = vmatprep.subr.bf16.mxu1 %v5887_v11 }
 0x471   :  { %5386 = vmatmul.mubr.msk.f32.vlgmr.msra.gmra.mrb[32].mxu0 %vm39_vm0, %v6055_v56  ;;  %v1881_v56 = vpop.f32.mrb[16].mxu1 }
 0x472   :  { %5644 = vmatpush3.bf16.msra.mxu0 %v6389_v47  ;;  %5392 = vmatprep.mubr.msk.f32.mxu0 %vm5888_vm1, %v5889_v12  ;;  %v5268_v31 = vpop.f32.mrb[17].mxu1 }
 0x473   :  { %5653 = vmatprep.subr.bf16.mxu0 %v5887_v11  ;;  %v2025_v49 = vpop.f32.mrb[18].mxu1  ;;  %2049 = vrot.lane.b32.xlu1 %v1881_v56, %s5894_s24 }
 0x474   :  { %v5282_v50 = vpop.f32.mrb[19].mxu1 }
 0x477   :  { %2053 = vrot.lane.b32.xlu1 %v2025_v49, %s5896_s27 }
 0x479   :  { %5393 = vmatmul.mubr.msk.f32.vlgmr.msra.gmra.mrb[32].mxu0 %vm39_vm0, %v6063_v58 }
 0x47a   :  { %5413 = vmatprep.mubr.msk.f32.mxu0 %vm5888_vm1, %v5889_v12 }
 0x47b   :  { %5656 = vmatpush3.bf16.xpose.msk.msra.mxu0 %vm5988_vm3, %v6336_v39 }
 0x47c   :  { %5661 = vmatprep.subr.bf16.mxu0 %v5887_v11 }
 0x4dd   :  { %v2364_v58 = vpop.xlane.xlu1 %2363 }
 0x4de   :  { %v2365_v51 = vrot.slane %v2364_v58, 4 }
 0x4e0   :  { %v2366_v26 = vadd.f32 %v2365_v51, %v2364_v58 }
 0x4e2   :  { %v2367_v52 = vrot.slane %v2366_v26, 2 }
 0x4e4   :  { %v2368_v53 = vadd.f32 %v2367_v52, %v2366_v26 }
 0x4e6   :  { %v2369_v54 = vrot.slane %v2368_v53, 1 }
 0x4e8   :  { %v2370_v55 = vadd.f32 %v2369_v54, %v2368_v53 }
 0x4ea   :  { %5722 = vpush %v2370_v55 }
 0x51b   :  { %s5723_s8 = spop %5722 }
 0x51c   :  { %s2372_s10 = sadd.f32 %s5723_s8, %s1449_s9 }
 0x520   :  { %v6411_v57 = vpop.f32.mrb[20].mxu1  ;;  %v6413_v61 = vpop.f32.mrb[26].mxu0 }
 0x521   :  { %v5317_v0 = vpop.f32.mrb[21].mxu1  ;;  %v5331_v1 = vpop.f32.mrb[27].mxu0 }
 0x528   :  { %v6415_v2 = vpop.f32.mrb[28].mxu0  ;;  %v6417_v3 = vpop.f32.mrb[22].mxu1 }
 0x529   :  { %v5345_v4 = vpop.f32.mrb[29].mxu0  ;;  %v5324_v62 = vpop.f32.mrb[23].mxu1 }
 0x530   :  { %v6419_v5 = vpop.f32.mrb[30].mxu0  ;;  %v2660_v7 = vpop.f32.mrb[24].mxu1 }
 0x531   :  { %v5359_v8 = vpop.f32.mrb[31].mxu0  ;;  %v5338_v9 = vpop.f32.mrb[25].mxu1 }
 0x538   :  { %v2804_v10 = vpop.f32.mrb[26].mxu1 }
 0x539   :  { %v5352_v13 = vpop.f32.mrb[27].mxu1  ;;  %2972 = vrot.lane.b32.xlu1 %v2804_v10, %s5894_s24 }
 0x540   :  { %v2948_v14 = vpop.f32.mrb[28].mxu1 }
 0x541   :  { %v5366_v15 = vpop.f32.mrb[29].mxu1 }
 0x54c   :  { %v3279_v16 = vpop.f32.mrb[32].mxu0 }
 0x54d   :  { %v5394_v21 = vpop.f32.mrb[33].mxu0  ;;  %5400 = vmatmul.mubr.msk.f32.vlgmr.msra.gmra.mrb[30].mxu1 %vm511_vm2, %v3279_v16  ;;  %5414 = vmatmul.mubr.msk.f32.vlgmr.msra.gmra.mrb[34].mxu0 %vm511_vm2, %v3279_v16  ;;  %v3284_v22 = vmul.f32 %v3279_v16, %v3279_v16 }
 0x54e   :  { %5652 = vmatpush3.bf16.xpose.msk.msra.mxu1 %vm5988_vm3, %v6179_v28  ;;  %5664 = vmatpush3.bf16.xpose.msk.msra.mxu0 %vm5988_vm3, %v6367_v48 }
 0x54f   :  { %v3285_v25 = vsel %vm511_vm2, %v3284_v22, 0.0  ;;  %5406 = vmatprep.mubr.msk.f32.mxu1 %vm5888_vm1, %v5889_v12  ;;  %5427 = vmatprep.mubr.msk.f32.mxu0 %vm5888_vm1, %v5889_v12 }
 0x550   :  { %3286 = vadd.xlane.f32.xlu0 %v3285_v25  ;;  %5657 = vmatprep.subr.bf16.mxu1 %v5887_v11 }
 0x551   :  { %5669 = vmatprep.subr.bf16.mxu0 %v5887_v11 }
 0x555   :  { %5407 = vmatmul.mubr.msk.f32.vlgmr.msra.gmra.mrb[32].mxu1 %vm511_vm2, %v6078_v59  ;;  %5428 = vmatmul.mubr.msk.f32.vlgmr.msra.gmra.mrb[36].mxu0 %vm511_vm2, %v3279_v16 }
 0x556   :  { %5660 = vmatpush3.bf16.xpose.msk.msra.mxu1 %vm5988_vm3, %v6336_v39  ;;  %5672 = vmatpush3.bf16.xpose.msk.msra.mxu0 %vm5988_vm3, %v6389_v47  ;;  %v3911_v39 = vand.u32 2147483648, %v3905_v19 }
 0x557   :  { %5420 = vmatprep.mubr.msk.f32.mxu1 %vm5888_vm1, %v5889_v12  ;;  %5441 = vmatprep.mubr.msk.f32.mxu0 %vm5888_vm1, %v5889_v12 }
 0x558   :  { %5665 = vmatprep.subr.bf16.mxu1 %v5887_v11  ;;  %5677 = vmatprep.subr.bf16.mxu0 %v5887_v11 }
 0x55d   :  { %5421 = vmatmul.mubr.msk.f32.vlgmr.msra.gmra.mrb[34].mxu1 %vm511_vm2, %v6078_v59  ;;  %5442 = vmatmul.mubr.msk.f32.vlgmr.msra.gmra.mrb[38].mxu0 %vm511_vm2, %v3279_v16 }
 0x55e   :  { %5668 = vmatpush3.bf16.xpose.msk.msra.mxu1 %vm5988_vm3, %v6367_v48  ;;  %5434 = vmatprep.mubr.msk.f32.mxu1 %vm5888_vm1, %v5889_v12 }
 0x55f   :  { %5673 = vmatprep.subr.bf16.mxu1 %v5887_v11  ;;  %5467 = vmatprep.mubr.msk.f32.mxu0 %vm5888_vm1, %v5889_v12 }
 0x565   :  { %5435 = vmatmul.mubr.msk.f32.vlgmr.msra.gmra.mrb[36].mxu1 %vm511_vm2, %v6078_v59 }
 0x566   :  { %5676 = vmatpush3.bf16.xpose.msk.msra.mxu1 %vm5988_vm3, %v6389_v47  ;;  %5448 = vmatprep.mubr.msk.f32.mxu1 %vm5888_vm1, %v5889_v12 }
 0x567   :  { %2045 = vrot.lane.b32.xlu0 %v6379_v46, %s5895_s4  ;;  %5689 = vmatprep.subr.bf16.mxu1 %v5887_v11 }
 0x56b   :  { %1130 = vrot.lane.b32.xlu0 %v6294_v6, %s5896_s27 }
 0x56d   :  { %5449 = vmatmul.mubr.msk.f32.vlgmr.msra.gmra.mrb[38].mxu1 %vm511_vm2, %v6078_v59  ;;  %v3909_v59 = vsel %vm3908_vm4, %v3905_v19, %v3907_v36 }
 0x56e   :  { %5474 = vmatprep.mubr.msk.f32.mxu1 %vm5888_vm1, %v5889_v12  ;;  %v3912_v12 = vsel %vm3910_vm5, %v3911_v39, %v3909_v59  ;;  %v4117_v59 = vld [vmem:[%s6643_s1 + $0x8] sm:$0xff] }
 0x56f   :  { %2968 = vrot.lane.b32.xlu0 %v2660_v7, %s5895_s4 }
 0x573   :  { %2976 = vrot.lane.b32.xlu0 %v2948_v14, %s5896_s27 }
 0x5dd   :  { %v3287_v28 = vpop.xlane.xlu0 %3286 }
 0x5de   :  { %v3288_v29 = vrot.slane %v3287_v28, 4 }
 0x5e0   :  { %v3289_v33 = vadd.f32 %v3288_v29, %v3287_v28 }
 0x5e2   :  { %v3290_v34 = vrot.slane %v3289_v33, 2 }
 0x5e4   :  { %v3291_v6 = vadd.f32 %v3290_v34, %v3289_v33 }
 0x5e6   :  { %v3292_v20 = vrot.slane %v3291_v6, 1 }
 0x5e8   :  { %v3293_v38 = vadd.f32 %v3292_v20, %v3291_v6  ;;  %v4116_v20 = vld [vmem:[%s6643_s1] sm:$0xff] }
 0x5ea   :  { %5724 = vpush %v3293_v38  ;;  %v4118_v38 = vld [vmem:[%s6643_s1 + $0x10] sm:$0xff] }
 0x5eb   :  { %5726 = vpush %v3912_v12  ;;  %v5678_v12 = vpack.c.bf16 %v4117_v59, %v4116_v20 }
 0x5ed   :  { %5679 = vmatpush3.bf16.msra.mxu0 %v5678_v12 }
 0x5ee   :  { %5680 = vmatprep.subr.bf16.mxu0 %v5887_v11 }
 0x61b   :  { %s5725_s2 = spop %5724 }
 0x61c   :  { %s3295_s11 = sadd.f32 %s5725_s2, %s2372_s10  ;;  %s5727_s12 = spop %5726 }
 0x61d   :  { %s3914_s13 = sadd.f32 1e-10, %s5727_s12 }
 0x61e   :  { %v3918_v30 = vstv %s3295_s11 }
 0x61f   :  { %5809 = vrsqrt.f32 %v3918_v30  ;;  %v3915_v40 = vstv %s3914_s13  ;;  %vm3921_vm6 = vcmp.eq.f32.partialorder %v3918_v30, inf  ;;  %v3924_v58 = vand.u32 2147483648, %v3918_v30 }
 0x620   :  { %5811 = vrcp.f32 %v3915_v40  ;;  %v6481_v48 = vpop.f32.mrb[30].mxu1  ;;  %v3513_v42 = vpop.f32.mrb[34].mxu0  ;;  %vm3923_vm7 = vcmp.eq.f32.partialorder %v3918_v30, 0.0 }
 0x621   :  { %v5401_v35 = vpop.f32.mrb[31].mxu1  ;;  %v5415_v44 = vpop.f32.mrb[35].mxu0 }
 0x622   :  { %v4121_v35 = vld [vmem:[%s6643_s1 + $0x28] sm:$0xff] }
 0x628   :  { %v6483_v46 = vpop.f32.mrb[32].mxu1  ;;  %v3657_v23 = vpop.f32.mrb[36].mxu0 }
 0x629   :  { %v5810_v47 = vpop.eup %5809  ;;  %v5408_v56 = vpop.f32.mrb[33].mxu1 }
 0x62a   :  { %v5429_v31 = vpop.f32.mrb[37].mxu0  ;;  %v5812_v49 = vpop.eup %5811  ;;  %v3920_v50 = vmul.f32 %v5810_v47, %v3918_v30  ;;  %v4122_v47 = vld [vmem:[%s6643_s1 + $0x30] sm:$0xff]  ;;  %v4123_v56 = vld [vmem:[%s6643_s1 + $0x38] sm:$0xff] }
 0x62b   :  { %5728 = vpush %v5812_v49 }
 0x62c   :  { %v3922_v51 = vsel %vm3921_vm6, %v3918_v30, %v3920_v50  ;;  %v4119_v30 = vld [vmem:[%s6643_s1 + $0x18] sm:$0xff]  ;;  %v5687_v50 = vpack.c.bf16 %v4123_v56, %v4122_v47 }
 0x62d   :  { %v3925_v26 = vsel %vm3923_vm7, %v3924_v58, %v3922_v51  ;;  %v5681_v40 = vpack.c.bf16 %v4119_v30, %v4118_v38 }
 0x62e   :  { %5730 = vpush %v3925_v26  ;;  %v3943_v26 = vlaneseq }
 0x62f   :  { %5682 = vmatpush3.bf16.msra.mxu0 %v5681_v40 }
 0x630   :  { %v3583_v52 = vpop.f32.mrb[34].mxu1  ;;  %v3801_v53 = vpop.f32.mrb[38].mxu0  ;;  %5683 = vmatprep.subr.bf16.mxu0 %v5887_v11 }
 0x631   :  { %v5422_v54 = vpop.f32.mrb[35].mxu1  ;;  %v5443_v55 = vpop.f32.mrb[39].mxu0  ;;  %3891 = vrot.lane.b32.xlu1 %v3583_v52, %s5895_s4 }
 0x638   :  { %v3727_v0 = vpop.f32.mrb[36].mxu1 }
 0x639   :  { %v5436_v1 = vpop.f32.mrb[37].mxu1  ;;  %3895 = vrot.lane.b32.xlu0 %v3727_v0, %s5894_s24 }
 0x63d   :  { %1106 = vrot.lane.b32.xlu0 %v6187_v43, %s5895_s4 }
 0x640   :  { %v3871_v4 = vpop.f32.mrb[38].mxu1 }
 0x641   :  { %v5450_v62 = vpop.f32.mrb[39].mxu1  ;;  %1110 = vrot.lane.b32.xlu0 %v6189_v37, %s5894_s24  ;;  %3899 = vrot.lane.b32.xlu1 %v3871_v4, %s5896_s27 }
 0x645   :  { %1114 = vrot.lane.b32.xlu0 %v6191_v45, %s5896_s27  ;;  %2030 = vrot.lane.b32.xlu1 %v6298_v18, %s5895_s4  ;;  %v1123_v45 = vpop.permute.xlu1 %1122  ;;  %v2046_v18 = vpop.permute.xlu0 %2045 }
 0x646   :  { %v2056_v10 = vsel %vm39_vm0, %v6374_v63, %v2046_v18 }
 0x649   :  { %2953 = vrot.lane.b32.xlu0 %v6413_v61, %s5895_s4  ;;  %2034 = vrot.lane.b32.xlu1 %v6300_v24, %s5894_s24  ;;  %v1127_v24 = vpop.permute.xlu1 %1126 }
 0x64d   :  { %2961 = vrot.lane.b32.xlu0 %v6419_v5, %s5896_s27  ;;  %2038 = vrot.lane.b32.xlu1 %v6302_v27, %s5896_s27  ;;  %v1133_v27 = vsel %vm39_vm0, %v6261_v60, %v1123_v45  ;;  %v2050_v61 = vpop.permute.xlu1 %2049 }
 0x64e   :  { %v1134_v7 = vsel %vm511_vm2, %v1133_v27, %v1127_v24  ;;  %v2057_v15 = vsel %vm511_vm2, %v2056_v10, %v2050_v61 }
 0x651   :  { %3880 = vrot.lane.b32.xlu0 %v3657_v23, %s5894_s24  ;;  %2957 = vrot.lane.b32.xlu1 %v6415_v2, %s5894_s24  ;;  %v1131_v2 = vpop.permute.xlu0 %1130  ;;  %v2054_v13 = vpop.permute.xlu1 %2053 }
 0x652   :  { %v1135_v8 = vsel %vm1119_vm8, %v1134_v7, %v1131_v2  ;;  %v2058_v22 = vsel %vm1119_vm8, %v2057_v15, %v2054_v13 }
 0x655   :  { %3876 = vrot.lane.b32.xlu1 %v3513_v42, %s5895_s4  ;;  %v2969_v14 = vpop.permute.xlu0 %2968  ;;  %v2973_v21 = vpop.permute.xlu1 %2972  ;;  %v4120_v42 = vld [vmem:[%s6643_s1 + $0x20] sm:$0xff] }
 0x656   :  { %v2979_v60 = vsel %vm39_vm0, %v6417_v3, %v2969_v14  ;;  %v5684_v23 = vpack.c.bf16 %v4121_v35, %v4120_v42 }
 0x657   :  { %v2980_v28 = vsel %vm511_vm2, %v2979_v60, %v2973_v21 }
 0x658   :  { %5685 = vmatpush3.bf16.msra.mxu0 %v5684_v23 }
 0x659   :  { %3884 = vrot.lane.b32.xlu1 %v3801_v53, %s5896_s27  ;;  %v2977_v29 = vpop.permute.xlu0 %2976  ;;  %5686 = vmatprep.subr.bf16.mxu0 %v5887_v11  ;;  %v3944_v53 = vshrl.u32 %v3943_v26, 7 }
 0x65a   :  { %v2981_v32 = vsel %vm1119_vm8, %v2980_v28, %v2977_v29 }
 0x65b   :  { %v6556_v55 = vsub.s32 1, %v3944_v53 }
 0x65c   :  { %s6509_s14 = spop %5728  ;;  %5688 = vmatpush3.bf16.msra.mxu0 %v5687_v50 }
 0x65d   :  { %v6514_v5 = vstv %s6509_s14 }
 0x65e   :  { %v3933_v9 = vmul.f32 %v6514_v5, %v1135_v8  ;;  %v3980_v19 = vmul.f32 %v6514_v5, %v2058_v22  ;;  %v4025_v33 = vmul.f32 %v6514_v5, %v2981_v32 }
 0x65f   :  { %s5731_s15 = spop %5730 }
 0x660   :  { %s3927_s16 = sadd.f32 1e-10, %s5731_s15  ;;  %v3934_v16 = vsub.f32 0.0, %v3933_v9  ;;  %v3981_v63 = vsub.f32 0.0, %v3980_v19  ;;  %v4026_v36 = vsub.f32 0.0, %v4025_v33  ;;  %v6565_v9 = vsub.s32 0, %v3944_v53 }
 0x662   :  { %v3928_v43 = vstv %s3927_s16  ;;  %v3935_v25 = vmul.f32 1.442695, %v3934_v16  ;;  %v3982_v34 = vmul.f32 1.442695, %v3981_v63  ;;  %v4027_v6 = vmul.f32 1.442695, %v4026_v36 }
 0x663   :  { %5813 = vrcp.f32 %v3928_v43 }
 0x664   :  { %5815 = vpow2.f32 %v3935_v25 }
 0x665   :  { %5817 = vpow2.f32 %v3982_v34 }
 0x666   :  { %5819 = vpow2.f32 %v4027_v6 }
 0x66d   :  { %v5814_v37 = vpop.eup %5813 }
 0x66e   :  { %5732 = vpush %v5814_v37  ;;  %v5816_v3 = vpop.eup %5815 }
 0x66f   :  { %v3937_v39 = vadd.f32 1.0, %v5816_v3  ;;  %v5818_v44 = vpop.eup %5817 }
 0x670   :  { %v3984_v31 = vadd.f32 1.0, %v5818_v44  ;;  %v5820_v49 = vpop.eup %5819 }
 0x671   :  { %5821 = vrcp.f32 %v3937_v39  ;;  %v4029_v58 = vadd.f32 1.0, %v5820_v49 }
 0x672   :  { %5823 = vrcp.f32 %v3984_v31 }
 0x673   :  { %5825 = vrcp.f32 %v4029_v58 }
 0x67b   :  { %v5822_v51 = vpop.eup %5821 }
 0x67c   :  { %v3940_v52 = vmax.f32 %v5822_v51, 1e-30  ;;  %v5824_v1 = vpop.eup %5823 }
 0x67d   :  { %v3987_v37 = vmax.f32 %v5824_v1, 1e-30  ;;  %v5826_v11 = vpop.eup %5825  ;;  %v3992_v38 = vrot.slane %v5824_v1, %v6565_v9 }
 0x67e   :  { %v3949_v0 = vmul.f32 -0.1, %v3940_v52  ;;  %v4032_v7 = vmax.f32 %v5826_v11, 1e-30  ;;  %v4037_v31 = vrot.slane %v5826_v11, %v6565_v9 }
 0x67f   :  { %v3995_v2 = vmul.f32 -0.1, %v3987_v37 }
 0x680   :  { %v3953_v43 = vrot.slane %v3949_v0, %v6556_v55  ;;  %v4040_v22 = vmul.f32 -0.1, %v4032_v7 }
 0x681   :  { %v3999_v21 = vrot.slane %v3995_v2, %v6556_v55 }
 0x682   :  { %5827 = vrcp.f32 %v3953_v43  ;;  %v4044_v32 = vrot.slane %v4040_v22, %v6556_v55 }
 0x68c   :  { %v5828_v63 = vpop.eup %5827 }
 0x69f   :  { %s5733_s1 = spop %5732 }
 0x6a0   :  { %s3931_s11 = smul.f32 %s5733_s1, %s6509_s14 }
 0x6a2   :  { %v3941_v16 = vstv %s3931_s11 }
 0x6a3   :  { %v3892_v4 = vpop.permute.xlu1 %3891 }
 0x6a4   :  { %v3902_v45 = vsel %vm39_vm0, %v6483_v46, %v3892_v4 }
 0x6ab   :  { %v3896_v54 = vpop.permute.xlu0 %3895 }
 0x6ac   :  { %v3903_v18 = vsel %vm511_vm2, %v3902_v45, %v3896_v54 }
 0x6af   :  { %v1107_v62 = vpop.permute.xlu0 %1106 }
 0x6b0   :  { %v1117_v10 = vsel %vm39_vm0, %v6185_v41, %v1107_v62 }
 0x6b3   :  { %v1111_v24 = vpop.permute.xlu0 %1110  ;;  %v3900_v27 = vpop.permute.xlu1 %3899 }
 0x6b4   :  { %v3904_v61 = vsel %vm1119_vm8, %v3903_v18, %v3900_v27  ;;  %v1118_v13 = vsel %vm511_vm2, %v1117_v10, %v1111_v24 }
 0x6b5   :  { %v4070_v8 = vmul.f32 %v6514_v5, %v3904_v61  ;;  %v3946_v5 = vrot.slane %v5822_v51, %v6565_v9 }
 0x6b7   :  { %v4071_v46 = vsub.f32 0.0, %v4070_v8  ;;  %v1115_v14 = vpop.permute.xlu0 %1114  ;;  %v2031_v15 = vpop.permute.xlu1 %2030 }
 0x6b8   :  { %v1120_v60 = vsel %vm1119_vm8, %v1118_v13, %v1115_v14  ;;  %v2041_v33 = vsel %vm39_vm0, %v6296_v17, %v2031_v15 }
 0x6b9   :  { %v4072_v25 = vmul.f32 1.442695, %v4071_v46  ;;  %v3942_v19 = vmul.f32 %v3941_v16, %v1120_v60 }
 0x6bb   :  { %5829 = vpow2.f32 %v4072_v25  ;;  %v3947_v28 = vsub.f32 %v3942_v19, %v3946_v5  ;;  %v2035_v29 = vpop.permute.xlu1 %2034  ;;  %v2954_v34 = vpop.permute.xlu0 %2953 }
 0x6bc   :  { %5831 = vrcp.f32 %v3999_v21  ;;  %v2042_v6 = vsel %vm511_vm2, %v2041_v33, %v2035_v29  ;;  %v2964_v12 = vsel %vm39_vm0, %v6411_v57, %v2954_v34 }
 0x6bd   :  { %v3948_v41 = vmul.f32 %v3947_v28, %v3947_v28  ;;  %5833 = vrcp.f32 %v4044_v32 }
 0x6bf   :  { %v3955_v36 = vmul.f32 %v5828_v63, %v3948_v41  ;;  %v2039_v3 = vpop.permute.xlu1 %2038  ;;  %v2962_v42 = vpop.permute.xlu0 %2961 }
 0x6c0   :  { %v2043_v20 = vsel %vm1119_vm8, %v2042_v6, %v2039_v3 }
 0x6c1   :  { %v3956_v59 = vmul.f32 1.442695, %v3955_v36  ;;  %v3988_v39 = vmul.f32 %v3941_v16, %v2043_v20 }
 0x6c3   :  { %5835 = vpow2.f32 %v3956_v59  ;;  %v3993_v30 = vsub.f32 %v3988_v39, %v3992_v38  ;;  %v2958_v40 = vpop.permute.xlu1 %2957  ;;  %v3881_v62 = vpop.permute.xlu0 %3880 }
 0x6c4   :  { %v2965_v17 = vsel %vm511_vm2, %v2964_v12, %v2958_v40 }
 0x6c5   :  { %v5830_v35 = vpop.eup %5829  ;;  %v3994_v44 = vmul.f32 %v3993_v30, %v3993_v30  ;;  %v2966_v23 = vsel %vm1119_vm8, %v2965_v17, %v2962_v42 }
 0x6c6   :  { %v5832_v47 = vpop.eup %5831  ;;  %v4074_v56 = vadd.f32 1.0, %v5830_v35  ;;  %v4033_v49 = vmul.f32 %v3941_v16, %v2966_v23 }
 0x6c7   :  { %v4001_v50 = vmul.f32 %v5832_v47, %v3994_v44  ;;  %v3877_v58 = vpop.permute.xlu1 %3876  ;;  %v5834_v52 = vpop.eup %5833 }
 0x6c8   :  { %5837 = vrcp.f32 %v4074_v56  ;;  %v4038_v51 = vsub.f32 %v4033_v49, %v4037_v31  ;;  %v3887_v54 = vsel %vm39_vm0, %v6481_v48, %v3877_v58 }
 0x6c9   :  { %v4002_v26 = vmul.f32 1.442695, %v4001_v50  ;;  %v3888_v37 = vsel %vm511_vm2, %v3887_v54, %v3881_v62 }
 0x6ca   :  { %v4039_v57 = vmul.f32 %v4038_v51, %v4038_v51 }
 0x6cb   :  { %5839 = vpow2.f32 %v4002_v26  ;;  %v3885_v1 = vpop.permute.xlu1 %3884 }
 0x6cc   :  { %v4046_v53 = vmul.f32 %v5834_v52, %v4039_v57  ;;  %v3889_v45 = vsel %vm1119_vm8, %v3888_v37, %v3885_v1 }
 0x6cd   :  { %v5836_v0 = vpop.eup %5835  ;;  %v4078_v48 = vmul.f32 %v3941_v16, %v3889_v45 }
 0x6ce   :  { %v3958_v4 = vmul.f32 4.0, %v5836_v0  ;;  %v4047_v43 = vmul.f32 1.442695, %v4046_v53 }
 0x6d0   :  { %v3960_v11 = vsel %vm3959_vm9, %v3958_v4, -inf  ;;  %5841 = vpow2.f32 %v4047_v43 }
 0x6d1   :  { %v3961_v18 = vrot.slane %v3960_v11, 4 }
 0x6d2   :  { %v5838_v24 = vpop.eup %5837 }
 0x6d3   :  { %v4077_v27 = vmax.f32 %v5838_v24, 1e-30  ;;  %v3962_v61 = vmax.f32 %v3960_v11, %v3961_v18  ;;  %v4082_v2 = vrot.slane %v5838_v24, %v6565_v9 }
 0x6d5   :  { %v5840_v7 = vpop.eup %5839  ;;  %v4085_v8 = vmul.f32 -0.1, %v4077_v27  ;;  %v3963_v10 = vrot.slane %v3962_v61, 2  ;;  %v4083_v13 = vsub.f32 %v4078_v48, %v4082_v2 }
 0x6d6   :  { %v4004_v46 = vmul.f32 4.0, %v5840_v7 }
 0x6d7   :  { %v3964_v14 = vmax.f32 %v3962_v61, %v3963_v10  ;;  %v4089_v15 = vrot.slane %v4085_v8, %v6556_v55  ;;  %v4084_v36 = vmul.f32 %v4083_v13, %v4083_v13 }
 0x6d8   :  { %v4005_v60 = vsel %vm3959_vm9, %v4004_v46, -inf }
 0x6d9   :  { %v3965_v21 = vrot.slane %v3964_v14, 1  ;;  %v4006_v22 = vrot.slane %v4005_v60, 4  ;;  %5843 = vrcp.f32 %v4089_v15 }
 0x6da   :  { %v5842_v25 = vpop.eup %5841 }
 0x6db   :  { %v3966_v19 = vmax.f32 %v3964_v14, %v3965_v21  ;;  %v4007_v5 = vmax.f32 %v4005_v60, %v4006_v22  ;;  %v4049_v28 = vmul.f32 4.0, %v5842_v25 }
 0x6dd   :  { %v3967_v29 = vsub.f32 %v3958_v4, %v3966_v19  ;;  %v4008_v9 = vrot.slane %v4007_v5, 2  ;;  %v4050_v16 = vsel %vm3959_vm9, %v4049_v28, -inf }
 0x6de   :  { %v4051_v41 = vrot.slane %v4050_v16, 4 }
 0x6df   :  { %v3968_v32 = vmul.f32 1.442695, %v3967_v29  ;;  %v4009_v63 = vmax.f32 %v4007_v5, %v4008_v9 }
 0x6e0   :  { %v4052_v33 = vmax.f32 %v4050_v16, %v4051_v41 }
 0x6e1   :  { %5845 = vpow2.f32 %v3968_v32  ;;  %v4010_v34 = vrot.slane %v4009_v63, 1 }
 0x6e2   :  { %v4053_v55 = vrot.slane %v4052_v33, 2 }
 0x6e3   :  { %v5844_v6 = vpop.eup %5843  ;;  %v4011_v3 = vmax.f32 %v4009_v63, %v4010_v34 }
 0x6e4   :  { %v4054_v20 = vmax.f32 %v4052_v33, %v4053_v55  ;;  %v4091_v59 = vmul.f32 %v5844_v6, %v4084_v36 }
 0x6e5   :  { %v4012_v38 = vsub.f32 %v4004_v46, %v4011_v3  ;;  %v4197_v3 = vld [vmem:[%s6647_s5] sm:$0xff] }
 0x6e6   :  { %v4055_v39 = vrot.slane %v4054_v20, 1  ;;  %v4092_v12 = vmul.f32 1.442695, %v4091_v59 }
 0x6e7   :  { %v4013_v30 = vmul.f32 1.442695, %v4012_v38 }
 0x6e8   :  { %v4056_v40 = vmax.f32 %v4054_v20, %v4055_v39  ;;  %5847 = vpow2.f32 %v4092_v12  ;;  %v4198_v20 = vld [vmem:[%s6647_s5 + $0x8] sm:$0xff] }
 0x6e9   :  { %5849 = vpow2.f32 %v4013_v30  ;;  %v5690_v38 = vpack.c.bf16 %v4198_v20, %v4197_v3 }
 0x6ea   :  { %v4057_v42 = vsub.f32 %v4049_v28, %v4056_v40 }
 0x6eb   :  { %v5846_v17 = vpop.eup %5845  ;;  %5691 = vmatpush3.bf16.msra.mxu1 %v5690_v38 }
 0x6ec   :  { %v3970_v35 = vsel %vm3959_vm9, %v5846_v17, 0.0  ;;  %v4058_v44 = vmul.f32 1.442695, %v4057_v42 }
 0x6ed   :  { %v3971_v23 = vrot.slane %v3970_v35, 4 }
 0x6ee   :  { %5851 = vpow2.f32 %v4058_v44 }
 0x6ef   :  { %v3972_v47 = vadd.f32 %v3971_v23, %v3970_v35 }
 0x6f1   :  { %v3973_v56 = vrot.slane %v3972_v47, 2 }
 0x6f2   :  { %v5848_v31 = vpop.eup %5847 }
 0x6f3   :  { %v5850_v49 = vpop.eup %5849  ;;  %v3974_v50 = vadd.f32 %v3973_v56, %v3972_v47  ;;  %v4094_v58 = vmul.f32 4.0, %v5848_v31 }
 0x6f4   :  { %v4015_v51 = vsel %vm3959_vm9, %v5850_v49, 0.0 }
 0x6f5   :  { %v4016_v26 = vrot.slane %v4015_v51, 4  ;;  %v4095_v57 = vsel %vm3959_vm9, %v4094_v58, -inf  ;;  %v3975_v53 = vrot.slane %v3974_v50, 1 }
 0x6f6   :  { %v4096_v52 = vrot.slane %v4095_v57, 4 }
 0x6f7   :  { %v4017_v54 = vadd.f32 %v4016_v26, %v4015_v51  ;;  %v3976_v45 = vadd.f32 %v3975_v53, %v3974_v50  ;;  %v4912_v51 = vld [vmem:[%s6648_s6] ss:$0 sm:$0xff]  ;;  %s5897_s6 = smov [#allocation2]  }
 0x6f8   :  { %v5852_v0 = vpop.eup %5851  ;;  %v4097_v1 = vmax.f32 %v4095_v57, %v4096_v52 }
 0x6f9   :  { %v4018_v4 = vrot.slane %v4017_v54, 2  ;;  %v4060_v62 = vsel %vm3959_vm9, %v5852_v0, 0.0  ;;  %5853 = vrcp.f32 %v3976_v45 }
 0x6fa   :  { %v4061_v43 = vrot.slane %v4060_v62, 4  ;;  %v4098_v37 = vrot.slane %v4097_v1, 2 }
 0x6fb   :  { %v4019_v11 = vadd.f32 %v4018_v4, %v4017_v54 }
 0x6fc   :  { %v4062_v18 = vadd.f32 %v4061_v43, %v4060_v62  ;;  %v4099_v24 = vmax.f32 %v4097_v1, %v4098_v37 }
 0x6fd   :  { %v4020_v27 = vrot.slane %v4019_v11, 1 }
 0x6fe   :  { %v4063_v61 = vrot.slane %v4062_v18, 2  ;;  %v4100_v2 = vrot.slane %v4099_v24, 1 }
 0x6ff   :  { %v4021_v48 = vadd.f32 %v4020_v27, %v4019_v11 }
 0x700   :  { %v4101_v7 = vmax.f32 %v4099_v24, %v4100_v2  ;;  %v4064_v8 = vadd.f32 %v4063_v61, %v4062_v18 }
 0x701   :  { %5855 = vrcp.f32 %v4021_v48 }
 0x702   :  { %v4102_v10 = vsub.f32 %v4094_v58, %v4101_v7  ;;  %v4065_v13 = vrot.slane %v4064_v8, 1 }
 0x703   :  { %v5854_v15 = vpop.eup %5853 }
 0x704   :  { %v4103_v46 = vmul.f32 1.442695, %v4102_v10  ;;  %v4066_v14 = vadd.f32 %v4065_v13, %v4064_v8  ;;  %v3978_v21 = vmul.f32 %v5854_v15, %v5846_v17 }
 0x706   :  { %5857 = vpow2.f32 %v4103_v46 }
 0x707   :  { %5859 = vrcp.f32 %v4066_v14 }
 0x70b   :  { %v5856_v60 = vpop.eup %5855 }
 0x70c   :  { %v4023_v22 = vmul.f32 %v5856_v60, %v5850_v49 }
 0x70e   :  { %v4024_v25 = vadd.f32 %v4023_v22, %v3978_v21 }
 0x710   :  { %v5858_v19 = vpop.eup %5857 }
 0x711   :  { %v5860_v5 = vpop.eup %5859  ;;  %v4105_v28 = vsel %vm3959_vm9, %v5858_v19, 0.0 }
 0x712   :  { %v4106_v29 = vrot.slane %v4105_v28, 4  ;;  %v4068_v9 = vmul.f32 %v5860_v5, %v5852_v0 }
 0x714   :  { %v4107_v16 = vadd.f32 %v4106_v29, %v4105_v28  ;;  %v4069_v41 = vadd.f32 %v4068_v9, %v4024_v25 }
 0x716   :  { %v4108_v32 = vrot.slane %v4107_v16, 2 }
 0x718   :  { %v4109_v63 = vadd.f32 %v4108_v32, %v4107_v16 }
 0x71a   :  { %v4110_v33 = vrot.slane %v4109_v63, 1 }
 0x71c   :  { %v4111_v34 = vadd.f32 %v4110_v33, %v4109_v63 }
 0x71e   :  { %5861 = vrcp.f32 %v4111_v34 }
 0x728   :  { %v5862_v55 = vpop.eup %5861 }
 0x729   :  { %v4113_v36 = vmul.f32 %v5862_v55, %v5858_v19 }
 0x72b   :  { %v4114_v6 = vadd.f32 %v4113_v36, %v4069_v41 }
 0x72d   :  { %v4115_v59 = vmul.f32 1.25, %v4114_v6 }
 0x72f   :  { %4509 = vrot.lane.b32.xlu1 %v4115_v59, %s5891_s20  ;;  %4393 = vrot.lane.b32.xlu0 %v4115_v59, %s5892_s23 }
 0x730   :  { %5468 = vmatmul.mubr.msk.f32.vlgmr.msra.gmra.mrb[40].mxu0 %vm3959_vm9, %v4115_v59 }
 0x733   :  { %4625 = vrot.lane.b32.xlu0 %v4115_v59, %s5893_s3 }
 0x758   :  { %4279 = vxpose.xlu1.b32.start.end [1/1] (short) (narrow) %v4115_v59, 16 }
 0x7a1   :  { %v4394_v39 = vpop.permute.xlu0 %4393  ;;  %v4510_v12 = vpop.permute.xlu1 %4509 }
 0x7a2   :  { %4396 = vxpose.xlu0.b32.start.end [1/1] (short) (narrow) %v4394_v39, 16 }
 0x7a5   :  { %v4626_v30 = vpop.permute.xlu0 %4625 }
 0x7a7   :  { %4512 = vxpose.xlu0.b32.start.end [1/1] (short) (narrow) %v4510_v12, 16 }
 0x7ac   :  { %4628 = vxpose.xlu0.b32.start.end [1/1] (short) (narrow) %v4626_v30, 16 }
 0x7d8   :  { %v4295_v23 = vpop.trf.xlu1 }
 0x7dc   :  { %v4296_v31 = vpop.trf.xlu1 }
 0x803   :  { %v4193_v40 = vpop.f32.mrb[40].mxu0 }
 0x804   :  { %v5469_v42 = vpop.f32.mrb[41].mxu0  ;;  %5475 = vmatmul.mubr.msk.f32.vlgmr.msra.gmra.mrb[40].mxu1 %vm39_vm0, %v4193_v40 }
 0x805   :  { %5479 = vmatprep.mubr.msk.f32.mxu1 %vm4311_vm10, %v4295_v23 }
 0x822   :  { %v4412_v17 = vpop.trf.xlu0 }
 0x826   :  { %v4413_v35 = vpop.trf.xlu0 }
 0x82a   :  { %v4528_v44 = vpop.trf.xlu0 }
 0x82b   :  { %5489 = vmatprep.mubr.msk.f32.mxu0 %vm4311_vm10, %v4528_v44 }
 0x82e   :  { %v4529_v47 = vpop.trf.xlu0 }
 0x832   :  { %v4644_v50 = vpop.trf.xlu0 }
 0x836   :  { %v4645_v58 = vpop.trf.xlu0 }
 0x8d7   :  { %v4268_v56 = vpop.f32.mrb[40].mxu1 }
 0x8d8   :  { %v5476_v49 = vpop.f32.mrb[41].mxu1  ;;  %5477 = vmatprep.subr.mxu1 %v4268_v56  ;;  %5487 = vmatprep.subr.mxu0 %v4268_v56 }
 0x8d9   :  { %5478 = vmatpush3.msra.mxu1 %v4268_v56  ;;  %5488 = vmatpush3.msra.mxu0 %v4268_v56 }
 0x8da   :  { %5480 = vmatmul.mubr.msk.f32.vlgmr.msra.gmra.mrb[42].mxu1 %vm4311_vm10, %v4296_v31  ;;  %5482 = vmatprep.subr.mxu1 %v4268_v56 }
 0x8db   :  { %5490 = vmatmul.mubr.msk.f32.vlgmr.msra.gmra.mrb[42].mxu0 %vm4311_vm10, %v4529_v47  ;;  %5483 = vmatpush3.msra.mxu1 %v4268_v56 }
 0x8dc   :  { %5484 = vmatprep.mubr.msk.f32.mxu1 %vm4311_vm10, %v4412_v17  ;;  %5492 = vmatprep.subr.mxu1 %v4268_v56 }
 0x8de   :  { %5485 = vmatmul.mubr.msk.f32.vlgmr.msra.gmra.mrb[44].mxu1 %vm4311_vm10, %v4413_v35 }
 0x8df   :  { %5493 = vmatpush3.msra.mxu1 %v4268_v56  ;;  %5494 = vmatprep.mubr.msk.f32.mxu1 %vm4311_vm10, %v4644_v50 }
 0x8e2   :  { %5495 = vmatmul.mubr.msk.f32.vlgmr.msra.gmra.mrb[46].mxu1 %vm4311_vm10, %v4645_v58 }
 0x9ad   :  { %v5481_v26 = vpop.f32.mrb[42].mxu1 }
 0x9ae   :  { %v5491_v57 = vpop.f32.mrb[42].mxu0  ;;  %v4390_v52 = vadd.f32 %v5481_v26, %v4912_v51  ;;  %v4384_v53 = vpop.f32.mrb[43].mxu1 }
 0x9af   :  { %v4616_v54 = vpop.f32.mrb[43].mxu0  ;;  %v4385_v0 = vadd.f32 %v4912_v51, %v4384_v53  ;;  %v4622_v37 = vadd.f32 %v5491_v57, %v4912_v51 }
 0x9b0   :  { %v4617_v1 = vadd.f32 %v4912_v51, %v4616_v54 }
 0x9b1   :  { %v5486_v4 = vpop.f32.mrb[44].mxu1 }
 0x9b2   :  { %v4506_v62 = vadd.f32 %v5486_v4, %v4912_v51  ;;  %4751 = vrot.lane.b32.xlu1 %v4617_v1, %s5890_s0  ;;  %v4500_v43 = vpop.f32.mrb[45].mxu1 }
 0x9b3   :  { %v4501_v18 = vadd.f32 %v4912_v51, %v4500_v43 }
 0x9b4   :  { %4745 = vrot.lane.b32.xlu0 %v4506_v62, %s5894_s24 }
 0x9b5   :  { %v5496_v11 = vpop.f32.mrb[46].mxu1 }
 0x9b6   :  { %4753 = vrot.lane.b32.xlu1 %v4622_v37, %s5890_s0  ;;  %v4732_v45 = vpop.f32.mrb[47].mxu1  ;;  %v4738_v27 = vadd.f32 %v5496_v11, %v4912_v51  ;;  %s4779_s0 = sshll.u32 %s5897_s6, 4  ;;  %s4780_s0 = int_to_ptr.vmem [resolvable:$true] %s4779_s0 }
 0x9b7   :  { %v4733_v24 = vadd.f32 %v4912_v51, %v4732_v45  ;;  %p5868_p1 = scmp.lt.s32.totalorder %s4780_s0, %s4780_s0 }
 0x9ba   :  { %4743 = vrot.lane.b32.xlu1 %v4501_v18, %s5894_s24 }
 0x9be   :  { %4759 = vrot.lane.b32.xlu1 %v4733_v24, %s5891_s20 }
 0x9c2   :  { %4761 = vrot.lane.b32.xlu1 %v4738_v27, %s5891_s20  ;;  %s5863_s20 = scalar_lea.vmem %s4780_s0, 256 }
 0x9c3   :  { %p5864_p0 = scmp.ne.s32.totalorder %s4780_s0, %s5863_s20  ;;  %p5869_p2 = scmp.lt.s32.totalorder %s5863_s20, %s5863_s20 }
 0x9c5   :  { %p5870_p3 = por %p5869_p2, %p5868_p1 }
 0x9c7   :  { %p5871_p4 = pnand %p5870_p3, %p5864_p0 }
 0xa24   :  { %v4752_v61 = vpop.permute.xlu1 %4751 }
 0xa26   :  { %v4746_v8 = vpop.permute.xlu0 %4745 }
 0xa27   :  { %v4766_v46 = vsel %vm511_vm2, %v4390_v52, %v4746_v8 }
 0xa28   :  { %v4754_v2 = vpop.permute.xlu1 %4753 }
 0xa29   :  { %v4768_v15 = vsel %vm3959_vm9, %v4766_v46, %v4754_v2 }
 0xa2c   :  { %v4744_v48 = vpop.permute.xlu1 %4743 }
 0xa2d   :  { %v4765_v7 = vsel %vm511_vm2, %v4385_v0, %v4744_v48 }
 0xa2e   :  { %v4767_v10 = vsel %vm3959_vm9, %v4765_v7, %v4752_v61 }
 0xa30   :  { %v4760_v13 = vpop.permute.xlu1 %4759 }
 0xa31   :  { %v4770_v14 = vsel %vm4769_vm11, %v4767_v10, %v4760_v13 }
 0xa32   :  { %4772 = vst [vmem:[#allocation2] sm:$0xff] %v4770_v14 }
 0xa34   :  { %v4762_v60 = vpop.permute.xlu1 %4761 }
 0xa35   :  { %v4771_v21 = vsel %vm4769_vm11, %v4768_v15, %v4762_v60 }
 0xa36   :  { %4773 = vst [vmem:[#allocation2 + $0x8] sm:$0xff] %v4771_v21 }
 0xa37   :  { %5874 = shalt.err (!%p5871_p4)
}
 0xa38   :  { %s5875_s16 = scalar_lea.hbm %s6649_s7, 256 }
 0xa39   :  { %p5876_p5 = scmp.ne.s32.totalorder %s6649_s7, %s5875_s16  ;;  %p5879_p6 = scmp.lt.u32.totalorder %s5875_s16, %s6649_s7 }
 0xa3b   :  { %p5881_p7 = pnand %p5879_p6, %p5876_p5 }
 0xa3d   :  { %5884 = shalt.err (!%p5881_p7)
}
 0xa3e   :  { %s5898_s22 = smov 128   ;;  %s5899_s25 = smov 8  }
 0xa3f   :  { %4785 = dma.vmem_to_hbm [thread:$0]  %s4780_s0, 256, %s6649_s7, [#allocation3], %s5898_s22, %s5898_s22, %s5899_s25  }
 0xa40   :  { %5885 = dma.done.wait [#allocation3], 256  }
 0xa41   :  { %5886 = vsyncadd [#allocation3], 4294967040 }
 0xa42   :  { %4789 = vsyncpa [#allocation3], 1 }

</bundles_post_ra>
